<compile_context>
chip_gen: v7x
topology: tpu7x:2x2x1
jax: 0.10.0
libtpu: 0.0.40
codegen_flags: <defaults>
</compile_context>

<pallas_src>
import functools

import jax
import jax.numpy as jnp
from jax.experimental import pallas as pl
from jax.experimental.pallas import tpu as pltpu


STATE_DIM = 4
NUM_HIDDEN = 128
NUM_ACTION = 2


def qnetwork_kernel(xT_ref, w1_ref, b1_ref, w2_ref, b2_ref, outT_ref):
    """out^T = W2 @ relu(W1 @ x^T + b1) + b2 for one batch tile.

    Per-block shapes:
      xT_ref  : (STATE_DIM, TB)          f32   batch on lanes
      w1_ref  : (NUM_HIDDEN, STATE_DIM)  f32   PyTorch (out, in) layout
      b1_ref  : (NUM_HIDDEN, 1)          f32
      w2_ref  : (NUM_ACTION, NUM_HIDDEN) f32   PyTorch (out, in) layout
      b2_ref  : (NUM_ACTION, 1)          f32
      outT_ref: (NUM_ACTION, TB)         f32   batch on lanes (lane-dense stores)
    """
    xT = xT_ref[...]
    w1 = w1_ref[...]

    # Layer 1: K=4 is too shallow for the MXU -> 4 VPU broadcast multiply-adds.
    # (128, 1) column of W1  *  (1, TB) batch row of x^T  -> (128, TB).
    hT = w1[:, 0:1] * xT[0:1, :]
    for k in range(1, STATE_DIM):
        hT = hT + w1[:, k : k + 1] * xT[k : k + 1, :]
    hT = jnp.maximum(hT + b1_ref[...], 0.0)  # bias add + ReLU stay f32 on the VPU

    # Layer 2: K=128 contraction on the MXU; bf16 operands, f32 accumulation.
    outT = jnp.dot(
        w2_ref[...].astype(jnp.bfloat16),
        hT.astype(jnp.bfloat16),
        preferred_element_type=jnp.float32,
    )
    outT_ref[...] = (outT + b2_ref[...]).astype(outT_ref.dtype)


@functools.partial(jax.jit, static_argnames=("tile_b",))
def qnetwork_forward(x, w1, b1, w2, b2, *, tile_b=512):
    """Forward pass matching the PyTorch module. Weights in PyTorch (out, in) layout."""
    if x.ndim < 2:
        x = x[None, :]  # match nn.Module's unsqueeze(0)
    batch = x.shape[0]

    num_tiles = -(-batch // tile_b)  # ceil div
    b_pad = num_tiles * tile_b

    # Put batch on the lane dimension; zero-pad the ragged tail to a full tile.
    xT = jnp.pad(x.astype(jnp.float32).T, ((0, 0), (0, b_pad - batch)))
    b1_col = b1.reshape(NUM_HIDDEN, 1).astype(jnp.float32)
    b2_col = b2.reshape(NUM_ACTION, 1).astype(jnp.float32)

    outT = pl.pallas_call(
        qnetwork_kernel,
        out_shape=jax.ShapeDtypeStruct((NUM_ACTION, b_pad), jnp.float32),
        grid=(num_tiles,),
        in_specs=[
            pl.BlockSpec((STATE_DIM, tile_b), lambda i: (0, i)),
            # Constant index_maps: weight/bias blocks are revisited, not re-DMA'd per step.
            pl.BlockSpec((NUM_HIDDEN, STATE_DIM), lambda i: (0, 0)),
            pl.BlockSpec((NUM_HIDDEN, 1), lambda i: (0, 0)),
            pl.BlockSpec((NUM_ACTION, NUM_HIDDEN), lambda i: (0, 0)),
            pl.BlockSpec((NUM_ACTION, 1), lambda i: (0, 0)),
        ],
        out_specs=pl.BlockSpec((NUM_ACTION, tile_b), lambda i: (0, i)),
        compiler_params=pltpu.CompilerParams(
            dimension_semantics=("parallel",),      # batch tiles are independent (megacore on v7x)
            vmem_limit_bytes=32 * 1024 * 1024,      # explicit, safe on v7x's 64 MiB VMEM
        ),
    )(xT, w1.astype(jnp.float32), b1_col, w2.astype(jnp.float32), b2_col)

    return outT[:, :batch].T  # back to (batch, NUM_ACTION)


def init_params(key):
    """Deterministic init mimicking nn.Linear default (uniform +/- 1/sqrt(fan_in)).

    Weights kept in PyTorch's native (out_features, in_features) layout.
    """
    k1, k2, k3, k4 = jax.random.split(key, 4)
    bound1 = 1.0 / jnp.sqrt(STATE_DIM)
    bound2 = 1.0 / jnp.sqrt(NUM_HIDDEN)
    w1 = jax.random.uniform(k1, (NUM_HIDDEN, STATE_DIM), jnp.float32, -bound1, bound1)
    b1 = jax.random.uniform(k2, (NUM_HIDDEN,), jnp.float32, -bound1, bound1)
    w2 = jax.random.uniform(k3, (NUM_ACTION, NUM_HIDDEN), jnp.float32, -bound2, bound2)
    b2 = jax.random.uniform(k4, (NUM_ACTION,), jnp.float32, -bound2, bound2)
    return w1, b1, w2, b2


def reference_forward(x, w1, b1, w2, b2):
    if x.ndim < 2:
        x = x[None, :]
    hidden = jnp.maximum(x @ w1.T + b1, 0.0)
    return hidden @ w2.T + b2


if __name__ == "__main__":
    key = jax.random.PRNGKey(0)
    pkey, xkey, x2key = jax.random.split(key, 3)
    w1, b1, w2, b2 = init_params(pkey)

    # Small batch (single grid step).
    batch = 8
    x = jax.random.normal(xkey, (batch, STATE_DIM), jnp.float32)
    out = jax.block_until_ready(qnetwork_forward(x, w1, b1, w2, b2))
    ref = reference_forward(x, w1, b1, w2, b2)
    assert out.shape == (batch, NUM_ACTION), out.shape
    # Tolerance relaxed vs f32: layer-2 MXU uses bf16 operands (f32 accumulation).
    assert jnp.allclose(out, ref, atol=5e-2, rtol=5e-2), (out, ref)

    # 1-D input path (module's unsqueeze(0) behavior).
    out1 = jax.block_until_ready(qnetwork_forward(x[0], w1, b1, w2, b2))
    assert out1.shape == (1, NUM_ACTION), out1.shape
    assert jnp.allclose(out1, ref[0:1], atol=5e-2, rtol=5e-2), (out1, ref[0:1])

    # Multi-tile parallel grid with a ragged tail.
    batch2 = 200
    x2 = jax.random.normal(x2key, (batch2, STATE_DIM), jnp.float32)
    out2 = jax.block_until_ready(qnetwork_forward(x2, w1, b1, w2, b2, tile_b=128))
    ref2 = reference_forward(x2, w1, b1, w2, b2)
    assert out2.shape == (batch2, NUM_ACTION), out2.shape
    assert jnp.allclose(out2, ref2, atol=5e-2, rtol=5e-2), (out2, ref2)

    print("KERNEL_OK")
</pallas_src>

<mosaic_0001>
module attributes {stable_mosaic.version = 11 : i64} {
  func.func @qnetwork_kernel(%arg0: i32, %arg1: memref<4x512xf32, #tpu.memory_space<vmem>>, %arg2: memref<128x4xf32, #tpu.memory_space<vmem>>, %arg3: memref<128x1xf32, #tpu.memory_space<vmem>>, %arg4: memref<2x128xf32, #tpu.memory_space<vmem>>, %arg5: memref<2x1xf32, #tpu.memory_space<vmem>>, %arg6: memref<2x512xf32, #tpu.memory_space<vmem>>) attributes {dimension_semantics = [#tpu.dimension_semantics<parallel>], iteration_bounds = array<i64: 1>, scalar_prefetch = 0 : i64, scratch_operands = 0 : i64, tpu.core_type = #tpu.core_type<tc>, window_params = [{transform_indices = @transform_0, window_bounds = array<i64: 4, 512>}, {pipeline_mode = #tpu.pipeline_mode<synchronous>, transform_indices = @transform_1, window_bounds = array<i64: 128, 4>}, {pipeline_mode = #tpu.pipeline_mode<synchronous>, transform_indices = @transform_2, window_bounds = array<i64: 128, 1>}, {pipeline_mode = #tpu.pipeline_mode<synchronous>, transform_indices = @transform_3, window_bounds = array<i64: 2, 128>}, {pipeline_mode = #tpu.pipeline_mode<synchronous>, transform_indices = @transform_4, window_bounds = array<i64: 2, 1>}, {transform_indices = @transform_5, window_bounds = array<i64: 2, 512>}]} {
    %c0 = arith.constant 0 : index
    %c0_0 = arith.constant 0 : index
    %0 = vector.load %arg1[%c0, %c0_0] : memref<4x512xf32, #tpu.memory_space<vmem>>, vector<4x512xf32>
    %c0_1 = arith.constant 0 : index
    %c0_2 = arith.constant 0 : index
    %1 = vector.load %arg2[%c0_1, %c0_2] : memref<128x4xf32, #tpu.memory_space<vmem>>, vector<128x4xf32>
    %2 = vector.extract_strided_slice %1 {offsets = [0, 0], sizes = [128, 1], strides = [1, 1]} : vector<128x4xf32> to vector<128x1xf32>
    %3 = vector.extract_strided_slice %0 {offsets = [0, 0], sizes = [1, 512], strides = [1, 1]} : vector<4x512xf32> to vector<1x512xf32>
    %4 = vector.broadcast %2 : vector<128x1xf32> to vector<128x512xf32>
    %5 = vector.broadcast %3 : vector<1x512xf32> to vector<128x512xf32>
    %6 = arith.mulf %4, %5 : vector<128x512xf32>
    %7 = vector.extract_strided_slice %1 {offsets = [0, 1], sizes = [128, 1], strides = [1, 1]} : vector<128x4xf32> to vector<128x1xf32>
    %8 = vector.extract_strided_slice %0 {offsets = [1, 0], sizes = [1, 512], strides = [1, 1]} : vector<4x512xf32> to vector<1x512xf32>
    %9 = vector.broadcast %7 : vector<128x1xf32> to vector<128x512xf32>
    %10 = vector.broadcast %8 : vector<1x512xf32> to vector<128x512xf32>
    %11 = arith.mulf %9, %10 : vector<128x512xf32>
    %12 = arith.addf %6, %11 : vector<128x512xf32>
    %13 = vector.extract_strided_slice %1 {offsets = [0, 2], sizes = [128, 1], strides = [1, 1]} : vector<128x4xf32> to vector<128x1xf32>
    %14 = vector.extract_strided_slice %0 {offsets = [2, 0], sizes = [1, 512], strides = [1, 1]} : vector<4x512xf32> to vector<1x512xf32>
    %15 = vector.broadcast %13 : vector<128x1xf32> to vector<128x512xf32>
    %16 = vector.broadcast %14 : vector<1x512xf32> to vector<128x512xf32>
    %17 = arith.mulf %15, %16 : vector<128x512xf32>
    %18 = arith.addf %12, %17 : vector<128x512xf32>
    %19 = vector.extract_strided_slice %1 {offsets = [0, 3], sizes = [128, 1], strides = [1, 1]} : vector<128x4xf32> to vector<128x1xf32>
    %20 = vector.extract_strided_slice %0 {offsets = [3, 0], sizes = [1, 512], strides = [1, 1]} : vector<4x512xf32> to vector<1x512xf32>
    %21 = vector.broadcast %19 : vector<128x1xf32> to vector<128x512xf32>
    %22 = vector.broadcast %20 : vector<1x512xf32> to vector<128x512xf32>
    %23 = arith.mulf %21, %22 : vector<128x512xf32>
    %24 = arith.addf %18, %23 : vector<128x512xf32>
    %c0_3 = arith.constant 0 : index
    %c0_4 = arith.constant 0 : index
    %25 = vector.load %arg3[%c0_3, %c0_4] : memref<128x1xf32, #tpu.memory_space<vmem>>, vector<128x1xf32>
    %26 = vector.broadcast %25 : vector<128x1xf32> to vector<128x512xf32>
    %27 = arith.addf %24, %26 : vector<128x512xf32>
    %cst = arith.constant 0.000000e+00 : f32
    %28 = vector.broadcast %cst : f32 to vector<128x512xf32>
    %29 = arith.maximumf %27, %28 : vector<128x512xf32>
    %c0_5 = arith.constant 0 : index
    %c0_6 = arith.constant 0 : index
    %30 = vector.load %arg4[%c0_5, %c0_6] : memref<2x128xf32, #tpu.memory_space<vmem>>, vector<2x128xf32>
    %31 = arith.truncf %30 : vector<2x128xf32> to vector<2x128xbf16>
    %32 = arith.truncf %29 : vector<128x512xf32> to vector<128x512xbf16>
    %cst_7 = arith.constant dense<0.000000e+00> : vector<2x512xf32>
    %33 = tpu.matmul %31, %32, %cst_7 {dimension_numbers = #tpu.dot_dimension_numbers<[1], [0], [0], [1], [0, 0, 1, 1], [], []>} : vector<2x128xbf16>, vector<128x512xbf16>, vector<2x512xf32> -> vector<2x512xf32>
    %c0_8 = arith.constant 0 : index
    %c0_9 = arith.constant 0 : index
    %34 = vector.load %arg5[%c0_8, %c0_9] : memref<2x1xf32, #tpu.memory_space<vmem>>, vector<2x1xf32>
    %35 = vector.broadcast %34 : vector<2x1xf32> to vector<2x512xf32>
    %36 = arith.addf %33, %35 : vector<2x512xf32>
    %c0_10 = arith.constant 0 : index
    %c0_11 = arith.constant 0 : index
    %37 = vector.load %arg6[%c0_10, %c0_11] : memref<2x512xf32, #tpu.memory_space<vmem>>, vector<2x512xf32>
    tpu.vector_store %arg6[%c0_10, %c0_11], %36 {strides = array<i32>} : memref<2x512xf32, #tpu.memory_space<vmem>>, vector<2x512xf32>,
    return
  }
  func.func @transform_0(%arg0: i32) -> (i32, i32) {
    %c0_i32 = arith.constant 0 : i32
    %c0_i32_0 = arith.constant 0 : i32
    return %c0_i32, %arg0 : i32, i32
  }
  func.func @transform_1(%arg0: i32) -> (i32, i32) {
    %c0_i32 = arith.constant 0 : i32
    %c0_i32_0 = arith.constant 0 : i32
    %c0_i32_1 = arith.constant 0 : i32
    return %c0_i32, %c0_i32_0 : i32, i32
  }
  func.func @transform_2(%arg0: i32) -> (i32, i32) {
    %c0_i32 = arith.constant 0 : i32
    %c0_i32_0 = arith.constant 0 : i32
    %c0_i32_1 = arith.constant 0 : i32
    return %c0_i32, %c0_i32_0 : i32, i32
  }
  func.func @transform_3(%arg0: i32) -> (i32, i32) {
    %c0_i32 = arith.constant 0 : i32
    %c0_i32_0 = arith.constant 0 : i32
    %c0_i32_1 = arith.constant 0 : i32
    return %c0_i32, %c0_i32_0 : i32, i32
  }
  func.func @transform_4(%arg0: i32) -> (i32, i32) {
    %c0_i32 = arith.constant 0 : i32
    %c0_i32_0 = arith.constant 0 : i32
    %c0_i32_1 = arith.constant 0 : i32
    return %c0_i32, %c0_i32_0 : i32, i32
  }
  func.func @transform_5(%arg0: i32) -> (i32, i32) {
    %c0_i32 = arith.constant 0 : i32
    %c0_i32_0 = arith.constant 0 : i32
    return %c0_i32, %arg0 : i32, i32
  }
}

</mosaic_0001>

<bundles_post_ra>
// kernel: qnetwork_forward.1
= control target key start
LH: loop header
LB: loop body
LE: loop exit
PB: predicated region body
PF: predicated region fallthrough
CT: control target
= control target key end

     0   :  { %v2381_v0 = vmov 1   ;;  %v2382_v5 = vmov 0   ;;  %v2380_v7 = vmov 2   ;;  %v2378_v10 = vmov 3   ;;  %s2372_s1 = inlined_call_operand.vmem [shape: f32[128,4], index: 1, kind: input, shape index: {}]   ;;  %s2373_s2 = inlined_call_operand.vmem [shape: f32[128,1], index: 2, kind: input, shape index: {}]   ;;  %s2374_s4 = inlined_call_operand.vmem [shape: f32[2,1], index: 4, kind: input, shape index: {}]   ;;  %s2375_s0 = inlined_call_operand.vmem [shape: f32[4,512], index: 0, kind: input, shape index: {}]   ;;  %s2376_s3 = inlined_call_operand.vmem [shape: f32[2,128], index: 3, kind: input, shape index: {}]   ;;  %s2377_s5 = inlined_call_operand.vmem [shape: f32[2,512], index: 5, kind: output, shape index: {}]  }
   0x1   :  { %1290 = vset.pattern.permute.xlu0 %v2381_v0  ;;  %1283 = vset.pattern.permute.xlu1 %v2381_v0  ;;  %v27_v1 = vld [vmem:[%s2372_s1 + $0x20] sm:$0xff]  ;;  %v24_v4 = vld [vmem:[%s2372_s1 + $0x8] sm:$0xff]  ;;  %v25_v8 = vld [vmem:[%s2372_s1 + $0x10] sm:$0xff]  ;;  %v121_v38 = vlaneseq }
   0x2   :  { %v23_v2 = vld [vmem:[%s2372_s1] sm:$0xff]  ;;  %238 = vperm.xlu0 %1290, %v27_v1   ;;  %1201 = vmatprep.mubr.bf16.mxu0 %v2382_v5  ;;  %v26_v9 = vld [vmem:[%s2372_s1 + $0x18] sm:$0xff]  ;;  %v28_v11 = vld [vmem:[%s2372_s1 + $0x28] sm:$0xff] }
   0x3   :  { %222 = vperm.xlu1 %1283, %v23_v2   ;;  %v1371_v3 = vld [vmem:[%s2372_s1 + $0x40] sm:$0xff]  ;;  %1242 = vmatprep.mubr.bf16.mxu1 %v2382_v5  ;;  %v30_v12 = vld [vmem:[%s2372_s1 + $0x38] sm:$0xff]  ;;  %v906_v15 = vld [vmem:[%s2373_s2 + $0x8] sm:$0xff]  ;;  %v1514_v41 = vshrl.u32 %v121_v38, 7 }
   0x4   :  { %v1382_v6 = vld [vmem:[%s2372_s1 + $0x60] sm:$0xff]  ;;  %v1413_v13 = vld [vmem:[%s2372_s1 + $0x58] sm:$0xff]  ;;  %v1427_v16 = vld [vmem:[%s2372_s1 + $0x70] sm:$0xff] }
   0x5   :  { %v905_v14 = vld [vmem:[%s2373_s2] sm:$0xff]  ;;  %2439 = vst [vmem:[#allocation2_spill] sm:$0xff] %v1427_v16  ;;  %v29_v17 = vld [vmem:[%s2372_s1 + $0x30] sm:$0xff]  ;;  %v908_v18 = vld [vmem:[%s2373_s2 + $0x18] sm:$0xff]  ;;  %v287_v45 = vsub.s32 1, %v1514_v41  ;;  %v291_v46 = vsub.s32 5, %v1514_v41 }
   0x6   :  { %254 = vperm.xlu0 %1290, %v1371_v3   ;;  %v907_v19 = vld [vmem:[%s2373_s2 + $0x10] sm:$0xff]  ;;  %v912_v20 = vld [vmem:[%s2373_s2 + $0x38] sm:$0xff]  ;;  %v32_v22 = vld [vmem:[%s2372_s1 + $0x48] sm:$0xff]  ;;  %2441 = vst [vmem:[#allocation4_spill] sm:$0xff] %v1514_v41  ;;  %v515_v47 = vsub.s32 2, %v1514_v41  ;;  %v519_v50 = vsub.s32 6, %v1514_v41 }
   0x7   :  { %226 = vperm.xlu1 %1283, %v24_v4   ;;  %v1455_v21 = vld [vmem:[%s2372_s1 + $0x78] sm:$0xff]  ;;  %v918_v24 = vld [vmem:[%s2373_s2 + $0x68] sm:$0xff]  ;;  %v1163_v25 = vld [vmem:[%s2374_s4] sm:$0x3]  ;;  %v123_v52 = vsub.s32 0, %v1514_v41  ;;  %v127_v53 = vsub.s32 4, %v1514_v41 }
   0x8   :  { %2440 = vst [vmem:[#allocation3_spill] sm:$0xff] %v1455_v21  ;;  %v916_v23 = vld [vmem:[%s2373_s2 + $0x58] sm:$0xff]  ;;  %v909_v26 = vld [vmem:[%s2373_s2 + $0x20] sm:$0xff]  ;;  %v910_v27 = vld [vmem:[%s2373_s2 + $0x28] sm:$0xff]  ;;  %v743_v59 = vsub.s32 3, %v1514_v41  ;;  %v747_v60 = vsub.s32 7, %v1514_v41 }
   0x9   :  { %v1488_v30 = vld [vmem:[%s2372_s1 + $0x50] sm:$0xff]  ;;  %v21_v48 = vld [vmem:[%s2375_s0] sm:$0xff]  ;;  %v22_v49 = vld [vmem:[%s2375_s0 + $0x8] sm:$0xff] }
   0xa   :  { %270 = vperm.xlu0 %1290, %v1382_v6   ;;  %v911_v42 = vld [vmem:[%s2373_s2 + $0x30] sm:$0xff]  ;;  %v288_v55 = vrot.slane %v21_v48, %v287_v45  ;;  %v292_v56 = vrot.slane %v21_v48, %v291_v46  ;;  %v296_v57 = vrot.slane %v22_v49, %v287_v45  ;;  %v516_v58 = vrot.slane %v21_v48, %v515_v47 }
   0xb   :  { %1284 = vset.pattern.permute.xlu1 %v2380_v7  ;;  %v300_v61 = vrot.slane %v22_v49, %v291_v46  ;;  %v524_v62 = vrot.slane %v22_v49, %v515_v47  ;;  %v520_v63 = vrot.slane %v21_v48, %v519_v50 }
   0xc   :  { %454 = vperm.xlu1 %1284, %v24_v4  }
   0xe   :  { %1311 = vset.pattern.permute.xlu0 %v2380_v7 }
   0xf   :  { %450 = vperm.xlu0 %1311, %v23_v2  }
  0x10   :  { %1285 = vset.pattern.permute.xlu1 %v2382_v5 }
  0x11   :  { %51 = vperm.xlu1 %1285, %v25_v8  }
  0x13   :  { %462 = vperm.xlu0 %1311, %v26_v9  }
  0x15   :  { %1286 = vset.pattern.permute.xlu1 %v2381_v0 }
  0x16   :  { %230 = vperm.xlu1 %1286, %v25_v8  }
  0x17   :  { %466 = vperm.xlu0 %1311, %v27_v1  }
  0x1a   :  { %234 = vperm.xlu1 %1286, %v26_v9  }
  0x1b   :  { %482 = vperm.xlu0 %1311, %v1371_v3  }
  0x1e   :  { %1287 = vset.pattern.permute.xlu1 %v2378_v10 }
  0x1f   :  { %682 = vperm.xlu1 %1287, %v24_v4   ;;  %498 = vperm.xlu0 %1311, %v1382_v6  }
  0x23   :  { %1288 = vset.pattern.permute.xlu1 %v2380_v7  ;;  %1315 = vset.pattern.permute.xlu0 %v2378_v10 }
  0x24   :  { %458 = vperm.xlu1 %1288, %v25_v8   ;;  %678 = vperm.xlu0 %1315, %v23_v2  }
  0x28   :  { %1289 = vset.pattern.permute.xlu1 %v2382_v5  ;;  %690 = vperm.xlu0 %1315, %v26_v9  }
  0x29   :  { %61 = vperm.xlu1 %1289, %v27_v1  }
  0x2c   :  { %694 = vperm.xlu0 %1315, %v27_v1   ;;  %v528_v1 = vrot.slane %v22_v49, %v519_v50 }
  0x2d   :  { %66 = vperm.xlu1 %1289, %v28_v11  }
  0x30   :  { %706 = vperm.xlu0 %1315, %v30_v12  }
  0x31   :  { %1291 = vset.pattern.permute.xlu1 %v2381_v0 }
  0x32   :  { %242 = vperm.xlu1 %1291, %v28_v11  }
  0x34   :  { %710 = vperm.xlu0 %1315, %v1371_v3  }
  0x36   :  { %1292 = vset.pattern.permute.xlu1 %v2378_v10 }
  0x37   :  { %686 = vperm.xlu1 %1292, %v25_v8  }
  0x38   :  { %722 = vperm.xlu0 %1315, %v1413_v13  }
  0x3b   :  { %1293 = vset.pattern.permute.xlu1 %v2382_v5 }
  0x3c   :  { %923 = vperm.xlu1 %1293, %v905_v14   ;;  %726 = vperm.xlu0 %1315, %v1382_v6   ;;  %v1552_v14 = vrot.slane %v516_v58, %v515_v47 }
  0x3e   :  { %2447 = vst [vmem:[#allocation10_spill] sm:$0xff] %v1552_v14 }
  0x40   :  { %928 = vperm.xlu1 %1293, %v906_v15   ;;  %734 = vperm.xlu0 %1315, %v1427_v16  }
  0x44   :  { %1294 = vset.pattern.permute.xlu1 %v2380_v7  ;;  %1322 = vset.pattern.permute.xlu0 %v2382_v5 }
  0x45   :  { %470 = vperm.xlu1 %1294, %v28_v11   ;;  %41 = vperm.xlu0 %1322, %v23_v2   ;;  %v124_v2 = vrot.slane %v21_v48, %v123_v52 }
  0x49   :  { %1295 = vset.pattern.permute.xlu1 %v2382_v5  ;;  %46 = vperm.xlu0 %1322, %v24_v4   ;;  %v132_v4 = vrot.slane %v22_v49, %v123_v52 }
  0x4a   :  { %71 = vperm.xlu1 %1295, %v29_v17  }
  0x4b   :  { %v1574_v38 = vrot.slane %v132_v4, %v123_v52 }
  0x4d   :  { %56 = vperm.xlu0 %1322, %v26_v9   ;;  %v1546_v9 = vrot.slane %v288_v55, %v287_v45 }
  0x4e   :  { %1296 = vset.pattern.permute.xlu1 %v2381_v0 }
  0x4f   :  { %246 = vperm.xlu1 %1296, %v29_v17   ;;  %2444 = vst [vmem:[#allocation7_spill] sm:$0xff] %v1546_v9 }
  0x51   :  { %76 = vperm.xlu0 %1322, %v30_v12  }
  0x53   :  { %250 = vperm.xlu1 %1296, %v30_v12  }
  0x55   :  { %938 = vperm.xlu0 %1322, %v908_v18   ;;  %v748_v18 = vrot.slane %v21_v48, %v747_v60 }
  0x57   :  { %1297 = vset.pattern.permute.xlu1 %v2378_v10 }
  0x58   :  { %698 = vperm.xlu1 %1297, %v28_v11   ;;  %v1548_v11 = vrot.slane %v292_v56, %v287_v45 }
  0x59   :  { %81 = vperm.xlu0 %1322, %v1371_v3   ;;  %v128_v3 = vrot.slane %v21_v48, %v127_v53 }
  0x5a   :  { %2445 = vst [vmem:[#allocation8_spill] sm:$0xff] %v1548_v11 }
  0x5c   :  { %1298 = vset.pattern.permute.xlu1 %v2382_v5 }
  0x5d   :  { %933 = vperm.xlu1 %1298, %v907_v19   ;;  %96 = vperm.xlu0 %1322, %v1413_v13   ;;  %v752_v19 = vrot.slane %v22_v49, %v743_v59 }
  0x5f   :  { %v1593_v55 = vrot.slane %v752_v19, %v743_v59 }
  0x61   :  { %1299 = vset.pattern.permute.xlu1 %v2380_v7  ;;  %958 = vperm.xlu0 %1322, %v912_v20   ;;  %v756_v20 = vrot.slane %v22_v49, %v747_v60 }
  0x62   :  { %474 = vperm.xlu1 %1299, %v29_v17  }
  0x63   :  { %v1595_v56 = vrot.slane %v756_v20, %v743_v59 }
  0x65   :  { %101 = vperm.xlu0 %1322, %v1382_v6   ;;  %v136_v6 = vrot.slane %v22_v49, %v127_v53 }
  0x66   :  { %478 = vperm.xlu1 %1299, %v30_v12   ;;  %v1550_v12 = vrot.slane %v296_v57, %v287_v45 }
  0x68   :  { %2446 = vst [vmem:[#allocation9_spill] sm:$0xff] %v1550_v12 }
  0x69   :  { %116 = vperm.xlu0 %1322, %v1455_v21  }
  0x6a   :  { %1300 = vset.pattern.permute.xlu1 %v2382_v5 }
  0x6b   :  { %86 = vperm.xlu1 %1300, %v32_v22  }
  0x6d   :  { %978 = vperm.xlu0 %1322, %v916_v23   ;;  %v1559_v23 = vrot.slane %v524_v62, %v515_v47 }
  0x6f   :  { %1301 = vset.pattern.permute.xlu1 %v2381_v0  ;;  %2449 = vst [vmem:[#allocation12_spill] sm:$0xff] %v1559_v23 }
  0x70   :  { %258 = vperm.xlu1 %1301, %v32_v22  }
  0x71   :  { %988 = vperm.xlu0 %1322, %v918_v24   ;;  %v1561_v24 = vrot.slane %v520_v63, %v515_v47 }
  0x73   :  { %2450 = vst [vmem:[#allocation13_spill] sm:$0xff] %v1561_v24 }
  0x74   :  { %1302 = vset.pattern.permute.xlu1 %v2378_v10 }
  0x75   :  { %702 = vperm.xlu1 %1302, %v29_v17   ;;  %1166 = vperm.xlu0 %1322, %v1163_v25   ;;  %v744_v17 = vrot.slane %v21_v48, %v743_v59  ;;  %v1563_v25 = vrot.slane %v528_v1, %v515_v47 }
  0x77   :  { %2451 = vst [vmem:[#allocation14_spill] sm:$0xff] %v1563_v25  ;;  %v1589_v53 = vrot.slane %v744_v17, %v743_v59 }
  0x79   :  { %1303 = vset.pattern.permute.xlu1 %v2382_v5 }
  0x7a   :  { %943 = vperm.xlu1 %1303, %v909_v26   ;;  %v1568_v26 = vld [vmem:[%s2372_s1 + $0x68] sm:$0xff] }
  0x7e   :  { %948 = vperm.xlu1 %1303, %v910_v27   ;;  %v1570_v27 = vrot.slane %v124_v2, %v123_v52 }
  0x80   :  { %2452 = vst [vmem:[#allocation15_spill] sm:$0xff] %v1570_v27 }
  0x81   :  { %v1483_v29 = vpop.permute.xlu0 %238 }
  0x82   :  { %1304 = vset.pattern.permute.xlu1 %v2380_v7  ;;  %v1481_v28 = vpop.permute.xlu1 %222  ;;  %v338_v46 = vmul.f32 %v1548_v11, %v1483_v29  ;;  %v339_v47 = vmul.f32 %v1550_v12, %v1483_v29 }
  0x83   :  { %486 = vperm.xlu1 %1304, %v32_v22  }
  0x85   :  { %v1492_v32 = vpop.permute.xlu0 %254 }
  0x86   :  { %v1490_v31 = vpop.permute.xlu1 %226 }
  0x87   :  { %1305 = vset.pattern.permute.xlu1 %v2382_v5 }
  0x88   :  { %91 = vperm.xlu1 %1305, %v1488_v30  }
  0x89   :  { %v1496_v33 = vpop.permute.xlu0 %270 }
  0x8b   :  { %v1498_v34 = vpop.permute.xlu1 %454 }
  0x8c   :  { %1306 = vset.pattern.permute.xlu1 %v2381_v0  ;;  %v1725_v41 = vmul.f32 %v1559_v23, %v1498_v34 }
  0x8d   :  { %262 = vperm.xlu1 %1306, %v1488_v30  }
  0x8e   :  { %v1502_v35 = vpop.permute.xlu0 %450  ;;  %2476 = vst [vmem:[#allocation39_spill] sm:$0xff] %v1725_v41 }
  0x90   :  { %v1504_v36 = vpop.permute.xlu1 %51 }
  0x91   :  { %266 = vperm.xlu1 %1306, %v1413_v13  }
  0x92   :  { %v1507_v37 = vpop.permute.xlu0 %462 }
  0x95   :  { %1307 = vset.pattern.permute.xlu1 %v2378_v10  ;;  %v1510_v39 = vpop.permute.xlu1 %230 }
  0x96   :  { %714 = vperm.xlu1 %1307, %v32_v22   ;;  %v1512_v40 = vpop.permute.xlu0 %466  ;;  %v1557_v22 = vrot.slane %v300_v61, %v287_v45  ;;  %v337_v45 = vmul.f32 %v1546_v9, %v1483_v29 }
  0x97   :  { %v565_v61 = vmul.f32 %v1552_v14, %v1512_v40  ;;  %v566_v62 = vmul.f32 %v1561_v24, %v1512_v40  ;;  %v568_v63 = vmul.f32 %v1563_v25, %v1512_v40 }
  0x98   :  { %2448 = vst [vmem:[#allocation11_spill] sm:$0xff] %v1557_v22  ;;  %v340_v48 = vmul.f32 %v1557_v22, %v1483_v29 }
  0x99   :  { %v1519_v43 = vpop.permute.xlu1 %234 }
  0x9a   :  { %1308 = vset.pattern.permute.xlu1 %v2382_v5  ;;  %v1522_v44 = vpop.permute.xlu0 %482 }
  0x9b   :  { %953 = vperm.xlu1 %1308, %v911_v42   ;;  %2442 = vst [vmem:[#allocation5_spill] sm:$0xff] %v1522_v44  ;;  %v1576_v42 = vrot.slane %v136_v6, %v123_v52  ;;  %v334_v44 = vmul.f32 %v1548_v11, %v1519_v43 }
  0x9d   :  { %2454 = vst [vmem:[#allocation17_spill] sm:$0xff] %v1576_v42 }
  0x9e   :  { %v1534_v51 = vpop.permute.xlu1 %682  ;;  %v1539_v54 = vpop.permute.xlu0 %498 }
  0x9f   :  { %1309 = vset.pattern.permute.xlu1 %v2380_v7  ;;  %2443 = vst [vmem:[#allocation6_spill] sm:$0xff] %v1539_v54 }
  0xa0   :  { %490 = vperm.xlu1 %1309, %v1488_v30  }
  0xa3   :  { %v1544_v8 = vpop.permute.xlu1 %458  ;;  %v1554_v15 = vpop.permute.xlu0 %678 }
  0xa4   :  { %494 = vperm.xlu1 %1309, %v1413_v13   ;;  %v1572_v13 = vrot.slane %v128_v3, %v123_v52  ;;  %v1591_v52 = vrot.slane %v748_v18, %v743_v59  ;;  %v567_v59 = vmul.f32 %v1559_v23, %v1512_v40  ;;  %v558_v41 = vmul.f32 %v1561_v24, %v1544_v8 }
  0xa6   :  { %2453 = vst [vmem:[#allocation16_spill] sm:$0xff] %v1572_v13 }
  0xa7   :  { %v1586_v49 = vpop.permute.xlu0 %690 }
  0xa8   :  { %1310 = vset.pattern.permute.xlu1 %v2382_v5  ;;  %v62_v50 = vpop.permute.xlu1 %61 }
  0xa9   :  { %106 = vperm.xlu1 %1310, %v1568_v26   ;;  %v173_v57 = vmul.f32 %v1570_v27, %v62_v50  ;;  %v174_v58 = vmul.f32 %v1572_v13, %v62_v50  ;;  %v175_v29 = vmul.f32 %v1574_v38, %v62_v50  ;;  %v176_v60 = vmul.f32 %v1576_v42, %v62_v50 }
  0xab   :  { %v401_v1 = vadd.f32 %v337_v45, %v173_v57  ;;  %v402_v2 = vadd.f32 %v338_v46, %v174_v58  ;;  %v403_v3 = vadd.f32 %v339_v47, %v175_v29  ;;  %v404_v4 = vadd.f32 %v340_v48, %v176_v60  ;;  %v695_v6 = vpop.permute.xlu0 %694 }
  0xac   :  { %v1610_v17 = vpop.permute.xlu1 %66  ;;  %v793_v18 = vmul.f32 %v1589_v53, %v695_v6  ;;  %v794_v19 = vmul.f32 %v1591_v52, %v695_v6  ;;  %v795_v20 = vmul.f32 %v1593_v55, %v695_v6  ;;  %v796_v50 = vmul.f32 %v1595_v56, %v695_v6 }
  0xad   :  { %2455 = vst [vmem:[#allocation18_spill] sm:$0xff] %v1610_v17  ;;  %1312 = vset.pattern.permute.xlu1 %v2381_v0  ;;  %v629_v40 = vadd.f32 %v565_v61, %v401_v1  ;;  %v630_v45 = vadd.f32 %v566_v62, %v402_v2  ;;  %v631_v46 = vadd.f32 %v567_v59, %v403_v3  ;;  %v913_v62 = vld [vmem:[%s2373_s2 + $0x40] sm:$0xff] }
  0xae   :  { %274 = vperm.xlu1 %1312, %v1568_v26   ;;  %v632_v47 = vadd.f32 %v568_v63, %v404_v4  ;;  %v914_v63 = vld [vmem:[%s2373_s2 + $0x48] sm:$0xff]  ;;  %v1651_v3 = vmul.f32 %v1546_v9, %v1481_v28  ;;  %v1655_v4 = vmul.f32 %v1548_v11, %v1481_v28  ;;  %v1713_v0 = vmul.f32 %v1548_v11, %v1496_v33 }
  0xaf   :  { %v1618_v48 = vpop.permute.xlu0 %706  ;;  %v1624_v58 = vadd.f32 %v793_v18, %v629_v40  ;;  %v1626_v29 = vadd.f32 %v794_v19, %v630_v45  ;;  %v1628_v60 = vadd.f32 %v795_v20, %v631_v46  ;;  %v1659_v18 = vmul.f32 %v1550_v12, %v1481_v28 }
  0xb0   :  { %2456 = vst [vmem:[#allocation19_spill] sm:$0xff] %v1618_v48  ;;  %v1630_v6 = vadd.f32 %v796_v50, %v632_v47  ;;  %v1663_v19 = vmul.f32 %v1557_v22, %v1481_v28  ;;  %v1667_v20 = vmul.f32 %v1546_v9, %v1490_v31  ;;  %v1673_v40 = vmul.f32 %v1548_v11, %v1490_v31 }
  0xb1   :  { %v1620_v57 = vpop.permute.xlu1 %242  ;;  %2458 = vst [vmem:[#allocation21_spill] sm:$0xff] %v1624_v58  ;;  %2459 = vst [vmem:[#allocation22_spill] sm:$0xff] %v1626_v29  ;;  %v1677_v45 = vmul.f32 %v1550_v12, %v1490_v31  ;;  %v1681_v46 = vmul.f32 %v1557_v22, %v1490_v31  ;;  %v1685_v28 = vmul.f32 %v1546_v9, %v1492_v32 }
  0xb2   :  { %2457 = vst [vmem:[#allocation20_spill] sm:$0xff] %v1620_v57  ;;  %1313 = vset.pattern.permute.xlu1 %v2378_v10  ;;  %2460 = vst [vmem:[#allocation23_spill] sm:$0xff] %v1628_v60  ;;  %v1700_v31 = vmul.f32 %v1557_v22, %v1492_v32  ;;  %v1704_v10 = vmul.f32 %v1546_v9, %v1496_v33  ;;  %v1735_v48 = vmul.f32 %v1563_v25, %v1498_v34 }
  0xb3   :  { %718 = vperm.xlu1 %1313, %v1488_v30   ;;  %2461 = vst [vmem:[#allocation24_spill] sm:$0xff] %v1630_v6  ;;  %v1632_v61 = vpop.permute.xlu0 %710  ;;  %2466 = vst [vmem:[#allocation29_spill] sm:$0xff] %v1685_v28  ;;  %v1739_v6 = vmul.f32 %v1552_v14, %v1502_v35  ;;  %v331_v60 = vmul.f32 %v1550_v12, %v1510_v39  ;;  %v332_v29 = vmul.f32 %v1557_v22, %v1510_v39 }
  0xb4   :  { %2462 = vst [vmem:[#allocation25_spill] sm:$0xff] %v1632_v61  ;;  %2470 = vst [vmem:[#allocation33_spill] sm:$0xff] %v1700_v31  ;;  %v2478_v31 = vmov 0   ;;  %v1772_v28 = vmul.f32 %v1552_v14, %v1507_v37  ;;  %v333_v57 = vmul.f32 %v1546_v9, %v1519_v43 }
  0xb5   :  { %2471 = vst [vmem:[#allocation34_spill] sm:$0xff] %v1704_v10  ;;  %2473 = vst [vmem:[#allocation36_spill] sm:$0xff] %v1713_v0  ;;  %v165_v0 = vmul.f32 %v1570_v27, %v1504_v36 }
  0xb6   :  { %v1637_v59 = vpop.permute.xlu1 %686 }
  0xb7   :  { %1314 = vset.pattern.permute.xlu1 %v2382_v5  ;;  %v1640_v30 = vpop.permute.xlu0 %722  ;;  %v1717_v5 = vmul.f32 %v1550_v12, %v1496_v33 }
  0xb8   :  { %963 = vperm.xlu1 %1314, %v913_v62   ;;  %2463 = vst [vmem:[#allocation26_spill] sm:$0xff] %v1640_v30  ;;  %v1692_v62 = vmul.f32 %v1548_v11, %v1492_v32  ;;  %v1731_v30 = vmul.f32 %v1561_v24, %v1498_v34 }
  0xb9   :  { %2474 = vst [vmem:[#allocation37_spill] sm:$0xff] %v1717_v5  ;;  %v1759_v5 = vmul.f32 %v1563_v25, %v1502_v35 }
  0xba   :  { %2468 = vst [vmem:[#allocation31_spill] sm:$0xff] %v1692_v62  ;;  %v168_v62 = vmul.f32 %v1576_v42, %v1504_v36 }
  0xbb   :  { %v1645_v1 = vpop.permute.xlu1 %923  ;;  %v1647_v2 = vpop.permute.xlu0 %726 }
  0xbc   :  { %968 = vperm.xlu1 %1314, %v914_v63   ;;  %2464 = vst [vmem:[#allocation27_spill] sm:$0xff] %v1647_v2  ;;  %v1696_v63 = vmul.f32 %v1550_v12, %v1492_v32  ;;  %v1721_v32 = vmul.f32 %v1557_v22, %v1496_v33  ;;  %v330_v33 = vmul.f32 %v1548_v11, %v1510_v39 }
  0xbd   :  { %v1781_v2 = vmul.f32 %v1559_v23, %v1507_v37  ;;  %v396_v54 = vadd.f32 %v332_v29, %v168_v62  ;;  %v335_v29 = vmul.f32 %v1550_v12, %v1519_v43  ;;  %v560_v62 = vmul.f32 %v1563_v25, %v1544_v8 }
  0xbe   :  { %2469 = vst [vmem:[#allocation32_spill] sm:$0xff] %v1696_v63  ;;  %2475 = vst [vmem:[#allocation38_spill] sm:$0xff] %v1721_v32  ;;  %v1751_v32 = vmul.f32 %v1561_v24, %v1502_v35  ;;  %v167_v63 = vmul.f32 %v1574_v38, %v1504_v36  ;;  %v1833_v12 = vmul.f32 %v1593_v55, %v1554_v15 }
  0xbf   :  { %v1669_v50 = vpop.permute.xlu1 %928  ;;  %v1688_v47 = vpop.permute.xlu0 %734 }
  0xc0   :  { %2465 = vst [vmem:[#allocation28_spill] sm:$0xff] %v1669_v50  ;;  %1316 = vset.pattern.permute.xlu1 %v2380_v7  ;;  %2467 = vst [vmem:[#allocation30_spill] sm:$0xff] %v1688_v47  ;;  %v1709_v7 = vmul.f32 %v1552_v14, %v1498_v34  ;;  %v329_v47 = vmul.f32 %v1546_v9, %v1510_v39  ;;  %v1755_v34 = vmul.f32 %v1559_v23, %v1502_v35 }
  0xc1   :  { %502 = vperm.xlu1 %1316, %v1568_v26   ;;  %v166_v39 = vmul.f32 %v1572_v13, %v1504_v36  ;;  %v1777_v35 = vmul.f32 %v1561_v24, %v1507_v37  ;;  %v395_v17 = vadd.f32 %v331_v60, %v167_v63  ;;  %v557_v50 = vmul.f32 %v1552_v14, %v1544_v8 }
  0xc2   :  { %2472 = vst [vmem:[#allocation35_spill] sm:$0xff] %v1709_v7  ;;  %v393_v61 = vadd.f32 %v329_v47, %v165_v0  ;;  %v336_v60 = vmul.f32 %v1557_v22, %v1519_v43  ;;  %v1805_v47 = vmul.f32 %v1589_v53, %v1534_v51  ;;  %v2481_v63 = vmov 1   ;;  %2484 = vst [vmem:[#allocation45_spill] sm:$0xff] %v1833_v12 }
  0xc3   :  { %v394_v36 = vadd.f32 %v330_v33, %v166_v39  ;;  %v1812_v33 = vmul.f32 %v1591_v52, %v1534_v51  ;;  %v1816_v39 = vmul.f32 %v1593_v55, %v1534_v51  ;;  %v1823_v22 = vmul.f32 %v1595_v56, %v1534_v51 }
  0xc4   :  { %v1747_v58 = vpop.permute.xlu1 %470  ;;  %v42_v10 = vpop.permute.xlu0 %41  ;;  %2480 = vst [vmem:[#allocation42_spill] sm:$0xff] %v1805_v47  ;;  %v621_v11 = vadd.f32 %v557_v50, %v393_v61  ;;  %v624_v51 = vadd.f32 %v560_v62, %v396_v54  ;;  %v789_v54 = vmul.f32 %v1589_v53, %v1586_v49 }
  0xc5   :  { %2477 = vst [vmem:[#allocation40_spill] sm:$0xff] %v1747_v58  ;;  %1317 = vset.pattern.permute.xlu1 %v2478_v31  ;;  %v1785_v58 = vmul.f32 %v1563_v25, %v1507_v37  ;;  %v559_v37 = vmul.f32 %v1559_v23, %v1544_v8  ;;  %2482 = vst [vmem:[#allocation43_spill] sm:$0xff] %v1816_v39  ;;  %v160_v43 = vmul.f32 %v1576_v42, %v42_v10 }
  0xc6   :  { %111 = vperm.xlu1 %1317, %v1427_v16   ;;  %v1827_v8 = vmul.f32 %v1589_v53, %v1554_v15  ;;  %v622_v9 = vadd.f32 %v558_v41, %v394_v36  ;;  %v780_v23 = vmul.f32 %v1595_v56, %v1554_v15  ;;  %v157_v14 = vmul.f32 %v1570_v27, %v42_v10 }
  0xc7   :  { %v623_v25 = vadd.f32 %v559_v37, %v395_v17  ;;  %v388_v12 = vadd.f32 %v1663_v19, %v160_v43  ;;  %v792_v19 = vmul.f32 %v1595_v56, %v1586_v49 }
  0xc8   :  { %v47_v7 = vpop.permute.xlu0 %46  ;;  %2483 = vst [vmem:[#allocation44_spill] sm:$0xff] %v1827_v8  ;;  %v385_v37 = vadd.f32 %v1651_v3, %v157_v14  ;;  %v785_v14 = vmul.f32 %v1589_v53, %v1637_v59 }
  0xc9   :  { %v1797_v0 = vpop.permute.xlu1 %71  ;;  %v162_v41 = vmul.f32 %v1572_v13, %v47_v7  ;;  %v164_v17 = vmul.f32 %v1576_v42, %v47_v7  ;;  %v161_v62 = vmul.f32 %v1570_v27, %v47_v7  ;;  %v163_v43 = vmul.f32 %v1574_v38, %v47_v7 }
  0xca   :  { %2479 = vst [vmem:[#allocation41_spill] sm:$0xff] %v1797_v0  ;;  %1318 = vset.pattern.permute.xlu1 %v2481_v63  ;;  %v158_v0 = vmul.f32 %v1572_v13, %v42_v10  ;;  %v778_v63 = vmul.f32 %v1591_v52, %v1554_v15 }
  0xcb   :  { %278 = vperm.xlu1 %1318, %v1427_v16   ;;  %v159_v16 = vmul.f32 %v1574_v38, %v42_v10  ;;  %v790_v10 = vmul.f32 %v1591_v52, %v1586_v49 }
  0xcc   :  { %v57_v24 = vpop.permute.xlu0 %56  ;;  %v386_v8 = vadd.f32 %v1655_v4, %v158_v0  ;;  %v1855_v4 = vmul.f32 %v1593_v55, %v1586_v49 }
  0xcd   :  { %v169_v39 = vmul.f32 %v1570_v27, %v57_v24  ;;  %v170_v15 = vmul.f32 %v1572_v13, %v57_v24  ;;  %v172_v61 = vmul.f32 %v1576_v42, %v57_v24  ;;  %v171_v50 = vmul.f32 %v1574_v38, %v57_v24 }
  0xce   :  { %v1840_v47 = vpop.permute.xlu1 %246  ;;  %v387_v0 = vadd.f32 %v1659_v18, %v159_v16  ;;  %v390_v42 = vadd.f32 %v1673_v40, %v162_v41  ;;  %v392_v13 = vadd.f32 %v1681_v46, %v164_v17  ;;  %v614_v49 = vadd.f32 %v1751_v32, %v386_v8 }
  0xcf   :  { %2485 = vst [vmem:[#allocation46_spill] sm:$0xff] %v1840_v47  ;;  %282 = vperm.xlu1 %1318, %v1455_v21   ;;  %v397_v36 = vadd.f32 %v333_v57, %v169_v39  ;;  %v2487_v21 = vmov 3   ;;  %v616_v24 = vadd.f32 %v1759_v5, %v388_v12  ;;  %v786_v16 = vmul.f32 %v1591_v52, %v1637_v59 }
  0xd0   :  { %v398_v57 = vadd.f32 %v334_v44, %v170_v15  ;;  %v400_v7 = vadd.f32 %v336_v60, %v172_v61  ;;  %v1875_v3 = vpop.permute.xlu0 %76  ;;  %v787_v18 = vmul.f32 %v1593_v55, %v1637_v59  ;;  %v788_v40 = vmul.f32 %v1595_v56, %v1637_v59  ;;  %v915_v44 = vld [vmem:[%s2373_s2 + $0x50] sm:$0xff] }
  0xd1   :  { %2488 = vst [vmem:[#allocation48_spill] sm:$0xff] %v1875_v3  ;;  %v399_v46 = vadd.f32 %v335_v29, %v171_v50  ;;  %v625_v5 = vadd.f32 %v1772_v28, %v397_v36  ;;  %v389_v12 = vadd.f32 %v1667_v20, %v161_v62  ;;  %v391_v32 = vadd.f32 %v1677_v45, %v163_v43  ;;  %v2494_v62 = vld [vmem:[#allocation42_spill] sm:$0xff] }
  0xd2   :  { %v1864_v47 = vpop.permute.xlu1 %250  ;;  %v613_v60 = vadd.f32 %v1739_v6, %v385_v37  ;;  %v618_v8 = vadd.f32 %v1731_v30, %v390_v42  ;;  %v842_v59 = vadd.f32 %v778_v63, %v614_v49  ;;  %v620_v29 = vadd.f32 %v1735_v48, %v392_v13  ;;  %v2495_v49 = vld [vmem:[#allocation43_spill] sm:$0xff] }
  0xd3   :  { %2486 = vst [vmem:[#allocation47_spill] sm:$0xff] %v1864_v47  ;;  %1319 = vset.pattern.permute.xlu1 %v2487_v21  ;;  %v844_v28 = vadd.f32 %v780_v23, %v616_v24  ;;  %v626_v20 = vadd.f32 %v1777_v35, %v398_v57  ;;  %v628_v45 = vadd.f32 %v1785_v58, %v400_v7  ;;  %v2489_v58 = vld [vmem:[#allocation35_spill] sm:$0xff]  ;;  %v2490_v35 = vld [vmem:[#allocation44_spill] sm:$0xff] }
  0xd4   :  { %730 = vperm.xlu1 %1319, %v1568_v26   ;;  %v615_v26 = vadd.f32 %v1755_v34, %v387_v0  ;;  %v849_v41 = vadd.f32 %v785_v14, %v621_v11  ;;  %v850_v17 = vadd.f32 %v786_v16, %v622_v9  ;;  %v627_v6 = vadd.f32 %v1781_v2, %v399_v46  ;;  %v939_v50 = vpop.permute.xlu0 %938  ;;  %v2491_v9 = vld [vmem:[#allocation39_spill] sm:$0xff]  ;;  %v2492_v2 = vld [vmem:[#allocation45_spill] sm:$0xff] }
  0xd5   :  { %v853_v15 = vadd.f32 %v789_v54, %v625_v5  ;;  %v851_v34 = vadd.f32 %v787_v18, %v623_v25  ;;  %v852_v61 = vadd.f32 %v788_v40, %v624_v51  ;;  %v846_v42 = vadd.f32 %v1812_v33, %v618_v8  ;;  %v2493_v51 = vld [vmem:[#allocation28_spill] sm:$0xff] }
  0xd6   :  { %v1002_v13 = vadd.f32 %v1645_v1, %v842_v59  ;;  %v848_v23 = vadd.f32 %v1823_v22, %v620_v29  ;;  %v1004_v48 = vadd.f32 %v1645_v1, %v844_v28  ;;  %v617_v30 = vadd.f32 %v2489_v58, %v389_v12  ;;  %v2501_v58 = vld [vmem:[#allocation10_spill] sm:$0xff] }
  0xd7   :  { %v1890_v39 = vpop.permute.xlu1 %698  ;;  %v841_v11 = vadd.f32 %v2490_v35, %v613_v60  ;;  %v619_v63 = vadd.f32 %v2491_v9, %v391_v32  ;;  %v843_v54 = vadd.f32 %v2492_v2, %v615_v26  ;;  %v854_v36 = vadd.f32 %v790_v10, %v626_v20  ;;  %v2502_v35 = vld [vmem:[#allocation13_spill] sm:$0xff]  ;;  %v2503_v9 = vld [vmem:[#allocation12_spill] sm:$0xff] }
  0xd8   :  { %1320 = vset.pattern.permute.xlu1 %v2478_v31  ;;  %v856_v25 = vadd.f32 %v792_v19, %v628_v45  ;;  %v1006_v37 = vadd.f32 %v2493_v51, %v846_v42  ;;  %v1008_v33 = vadd.f32 %v2493_v51, %v848_v23  ;;  %v845_v43 = vadd.f32 %v2494_v62, %v617_v30  ;;  %v2497_v19 = vld [vmem:[#allocation2_spill] sm:$0xff]  ;;  %v1914_v40 = vpop.permute.xlu0 %81  ;;  %v2510_v62 = vld [vmem:[#allocation9_spill] sm:$0xff] }
  0xd9   :  { %973 = vperm.xlu1 %1320, %v915_v44   ;;  %v1001_v22 = vadd.f32 %v1645_v1, %v841_v11  ;;  %v847_v24 = vadd.f32 %v2495_v49, %v619_v63  ;;  %v1003_v14 = vadd.f32 %v1645_v1, %v843_v54  ;;  %v2496_v16 = vmov 2   ;;  %v2506_v54 = vld [vmem:[#allocation20_spill] sm:$0xff] }
  0xda   :  { %v1066_v57 = vmax.f32 %v1002_v13, 0.0  ;;  %v1070_v7 = vmax.f32 %v1006_v37, 0.0  ;;  %v1068_v18 = vmax.f32 %v1004_v48, 0.0  ;;  %v1072_v10 = vmax.f32 %v1008_v33, 0.0  ;;  %v2499_v48 = vld [vmem:[#allocation3_spill] sm:$0xff] }
  0xdb   :  { %v855_v46 = vadd.f32 %v1855_v4, %v627_v6  ;;  %v1005_v5 = vadd.f32 %v2493_v51, %v845_v43  ;;  %v1007_v12 = vadd.f32 %v2493_v51, %v847_v24  ;;  %v1013_v44 = vadd.f32 %v939_v50, %v853_v15  ;;  %v2500_v15 = vld [vmem:[#allocation5_spill] sm:$0xff]  ;;  %v2508_v51 = vld [vmem:[#allocation8_spill] sm:$0xff]  ;;  %v2511_v43 = vld [vmem:[#allocation11_spill] sm:$0xff] }
  0xdc   :  { %v934_v0 = vpop.permute.xlu1 %933  ;;  %v1014_v60 = vadd.f32 %v939_v50, %v854_v36  ;;  %v1132_v1 = vpack.c.bf16 %v1070_v7, %v1066_v57  ;;  %v1134_v26 = vpack.c.bf16 %v1072_v10, %v1068_v18  ;;  %v1065_v8 = vmax.f32 %v1001_v22, 0.0  ;;  %v2507_v36 = vld [vmem:[#allocation7_spill] sm:$0xff]  ;;  %v2512_v18 = vld [vmem:[#allocation6_spill] sm:$0xff] }
  0xdd   :  { %1321 = vset.pattern.permute.xlu1 %v2496_v16  ;;  %v1010_v32 = vadd.f32 %v934_v0, %v850_v17  ;;  %v1069_v59 = vmax.f32 %v1005_v5, 0.0  ;;  %v1067_v29 = vmax.f32 %v1003_v14, 0.0  ;;  %v1071_v28 = vmax.f32 %v1007_v12, 0.0 }
  0xde   :  { %506 = vperm.xlu1 %1321, %v2497_v19   ;;  %v1016_v45 = vadd.f32 %v939_v50, %v856_v25  ;;  %1169 = vmatprep.subr.bf16.mxu0 %v1132_v1  ;;  %v1009_v42 = vadd.f32 %v934_v0, %v849_v41  ;;  %v1012_v4 = vadd.f32 %v934_v0, %v852_v61  ;;  %v1934_v61 = vpop.permute.xlu0 %96  ;;  %v1078_v33 = vmax.f32 %v1014_v60, 0.0  ;;  %v2513_v19 = vld [vmem:[#allocation18_spill] sm:$0xff]  ;;  %v2515_v1 = vld [vmem:[#allocation17_spill] sm:$0xff] }
  0xdf   :  { %1210 = vmatprep.subr.bf16.mxu1 %v1134_v26  ;;  %v1131_v6 = vpack.c.bf16 %v1069_v59, %v1065_v8  ;;  %v1133_v13 = vpack.c.bf16 %v1071_v28, %v1067_v29  ;;  %v1011_v23 = vadd.f32 %v934_v0, %v851_v34  ;;  %v1074_v17 = vmax.f32 %v1010_v32, 0.0  ;;  %2504 = vst [vmem:[#allocation44_spill] sm:$0xff] %v1934_v61  ;;  %v2505_v34 = vld [vmem:[#allocation14_spill] sm:$0xff]  ;;  %v2514_v32 = vld [vmem:[#allocation16_spill] sm:$0xff] }
  0xe0   :  { %v1924_v30 = vmul.f32 %v2501_v58, %v2500_v15  ;;  %v1928_v11 = vmul.f32 %v2502_v35, %v2500_v15  ;;  %v1932_v63 = vmul.f32 %v2503_v9, %v2500_v15  ;;  %v1015_v41 = vadd.f32 %v939_v50, %v855_v46 }
  0xe1   :  { %v1919_v20 = vpop.permute.xlu1 %474  ;;  %v1938_v2 = vmul.f32 %v2505_v34, %v2500_v15  ;;  %v341_v25 = vmul.f32 %v2507_v36, %v2506_v54  ;;  %v342_v37 = vmul.f32 %v2508_v51, %v2506_v54  ;;  %1170 = vmatpush1.bf16.msra.mxu0 %v1131_v6  ;;  %1211 = vmatpush1.bf16.msra.mxu1 %v1133_v13  ;;  %v1076_v49 = vmax.f32 %v1012_v4, 0.0 }
  0xe2   :  { %2498 = vst [vmem:[#allocation35_spill] sm:$0xff] %v1919_v20  ;;  %510 = vperm.xlu1 %1321, %v2499_v48   ;;  %v343_v50 = vmul.f32 %v2510_v62, %v2506_v54  ;;  %v344_v22 = vmul.f32 %v2511_v43, %v2506_v54  ;;  %v1080_v24 = vmax.f32 %v1016_v45, 0.0  ;;  %v1136_v14 = vpack.c.bf16 %v1078_v33, %v1074_v17  ;;  %v2517_v17 = vld [vmem:[#allocation25_spill] sm:$0xff]  ;;  %v2523_v20 = vld [vmem:[#allocation27_spill] sm:$0xff] }
  0xe3   :  { %v1073_v16 = vmax.f32 %v1009_v42, 0.0  ;;  %v1077_v57 = vmax.f32 %v1013_v44, 0.0  ;;  %v1075_v7 = vmax.f32 %v1011_v23, 0.0  ;;  %v1953_v10 = vmul.f32 %v2501_v58, %v2512_v18  ;;  %v1976_v42 = vpop.permute.xlu0 %958 }
  0xe4   :  { %v177_v46 = vmul.f32 %v1570_v27, %v2513_v19  ;;  %v1138_v5 = vpack.c.bf16 %v1080_v24, %v1076_v49  ;;  %v1079_v12 = vmax.f32 %v1015_v41, 0.0  ;;  %v178_v60 = vmul.f32 %v2514_v32, %v2513_v19  ;;  %1171 = vmatprep.subr.bf16.mxu0 %v1136_v14  ;;  %2516 = vst [vmem:[#allocation45_spill] sm:$0xff] %v1976_v42 }
  0xe5   :  { %v1944_v0 = vpop.permute.xlu1 %478  ;;  %v179_v44 = vmul.f32 %v1574_v38, %v2513_v19  ;;  %v1135_v26 = vpack.c.bf16 %v1077_v57, %v1073_v16  ;;  %v1966_v8 = vmul.f32 %v2502_v35, %v2512_v18  ;;  %v1970_v59 = vmul.f32 %v2503_v9, %v2512_v18 }
  0xe6   :  { %2509 = vst [vmem:[#allocation39_spill] sm:$0xff] %v1944_v0  ;;  %1323 = vset.pattern.permute.xlu1 %v2487_v21  ;;  %v180_v21 = vmul.f32 %v2515_v1, %v2513_v19  ;;  %v1974_v29 = vmul.f32 %v2505_v34, %v2512_v18  ;;  %1212 = vmatprep.subr.bf16.mxu1 %v1138_v5  ;;  %v2531_v0 = vld [vmem:[#allocation38_spill] sm:$0xff] }
  0xe7   :  { %738 = vperm.xlu1 %1323, %v2499_v48   ;;  %v1137_v28 = vpack.c.bf16 %v1079_v12, %v1075_v7  ;;  %v405_v4 = vadd.f32 %v341_v25, %v177_v46  ;;  %v406_v6 = vadd.f32 %v342_v37, %v178_v60  ;;  %v407_v13 = vadd.f32 %v343_v50, %v179_v44  ;;  %v917_v48 = vld [vmem:[%s2373_s2 + $0x60] sm:$0xff]  ;;  %v2518_v37 = vld [vmem:[#allocation40_spill] sm:$0xff]  ;;  %v102_v7 = vpop.permute.xlu0 %101 }
  0xe8   :  { %v408_v23 = vadd.f32 %v344_v22, %v180_v21  ;;  %1172 = vmatpush1.bf16.msra.mxu0 %v1135_v26  ;;  %v1983_v15 = vmul.f32 %v1589_v53, %v2517_v17  ;;  %v1987_v41 = vmul.f32 %v1591_v52, %v2517_v17  ;;  %v1991_v54 = vmul.f32 %v1593_v55, %v2517_v17  ;;  %v919_v12 = vld [vmem:[%s2373_s2 + $0x70] sm:$0xff] }
  0xe9   :  { %v1995_v25 = vmul.f32 %v1595_v56, %v2517_v17  ;;  %1213 = vmatpush1.bf16.msra.mxu1 %v1137_v28  ;;  %v569_v33 = vmul.f32 %v2501_v58, %v2518_v37  ;;  %v570_v50 = vmul.f32 %v2502_v35, %v2518_v37  ;;  %v571_v22 = vmul.f32 %v2503_v9, %v2518_v37  ;;  %v2530_v58 = vld [vmem:[#allocation37_spill] sm:$0xff] }
  0xea   :  { %v87_v45 = vpop.permute.xlu1 %86  ;;  %v572_v49 = vmul.f32 %v2505_v34, %v2518_v37  ;;  %v189_v24 = vmul.f32 %v1570_v27, %v1914_v40  ;;  %v190_v14 = vmul.f32 %v2514_v32, %v1914_v40  ;;  %v191_v16 = vmul.f32 %v1574_v38, %v1914_v40 }
  0xeb   :  { %1324 = vset.pattern.permute.xlu1 %v2478_v31  ;;  %v192_v57 = vmul.f32 %v2515_v1, %v1914_v40  ;;  %v193_v18 = vmul.f32 %v1570_v27, %v87_v45  ;;  %v194_v19 = vmul.f32 %v2514_v32, %v87_v45  ;;  %v195_v31 = vmul.f32 %v1574_v38, %v87_v45 }
  0xec   :  { %983 = vperm.xlu1 %1324, %v917_v48   ;;  %v196_v46 = vmul.f32 %v2515_v1, %v87_v45  ;;  %v205_v26 = vmul.f32 %v1570_v27, %v102_v7  ;;  %v206_v28 = vmul.f32 %v2514_v32, %v102_v7  ;;  %v207_v48 = vmul.f32 %v1574_v38, %v102_v7 }
  0xed   :  { %v208_v45 = vmul.f32 %v2515_v1, %v102_v7  ;;  %v826_v34 = vmul.f32 %v1591_v52, %v2523_v20  ;;  %v827_v9 = vmul.f32 %v1593_v55, %v2523_v20  ;;  %v828_v7 = vmul.f32 %v1595_v56, %v2523_v20 }
  0xee   :  { %v633_v3 = vadd.f32 %v569_v33, %v405_v4 }
  0xef   :  { %v259_v5 = vpop.permute.xlu1 %258  ;;  %v436_v47 = vadd.f32 %v2531_v0, %v208_v45 }
  0xf0   :  { %v357_v60 = vmul.f32 %v2507_v36, %v259_v5  ;;  %v358_v44 = vmul.f32 %v2508_v51, %v259_v5  ;;  %v359_v40 = vmul.f32 %v2510_v62, %v259_v5  ;;  %v360_v21 = vmul.f32 %v2511_v43, %v259_v5  ;;  %993 = vperm.xlu1 %1324, %v919_v12  }
  0xf1   :  { %v825_v5 = vmul.f32 %v1589_v53, %v2523_v20  ;;  %v435_v20 = vadd.f32 %v2530_v58, %v207_v48  ;;  %v634_v43 = vadd.f32 %v570_v50, %v406_v6  ;;  %v635_v62 = vadd.f32 %v571_v22, %v407_v13 }
  0xf2   :  { %v2029_v17 = vadd.f32 %v357_v60, %v193_v18  ;;  %v2031_v37 = vadd.f32 %v358_v44, %v194_v19  ;;  %v2033_v61 = vadd.f32 %v359_v40, %v195_v31  ;;  %v2035_v42 = vadd.f32 %v360_v21, %v196_v46  ;;  %v920_v18 = vld [vmem:[%s2373_s2 + $0x78] sm:$0xff]  ;;  %v2525_v46 = vld [vmem:[#allocation31_spill] sm:$0xff]  ;;  %v2526_v60 = vld [vmem:[#allocation32_spill] sm:$0xff] }
  0xf3   :  { %v2524_v19 = vld [vmem:[#allocation29_spill] sm:$0xff]  ;;  %v418_v12 = vadd.f32 %v2525_v46, %v190_v14  ;;  %v419_v44 = vadd.f32 %v2526_v60, %v191_v16  ;;  %v797_v14 = vmul.f32 %v1589_v53, %v1890_v39  ;;  %v798_v16 = vmul.f32 %v1591_v52, %v1890_v39 }
  0xf4   :  { %2519 = vst [vmem:[#allocation28_spill] sm:$0xff] %v2029_v17  ;;  %2520 = vst [vmem:[#allocation42_spill] sm:$0xff] %v2031_v37  ;;  %v417_v31 = vadd.f32 %v2524_v19, %v189_v24  ;;  %v2527_v40 = vld [vmem:[#allocation33_spill] sm:$0xff]  ;;  %v2529_v17 = vld [vmem:[#allocation36_spill] sm:$0xff]  ;;  %v636_v24 = vadd.f32 %v572_v49, %v408_v23  ;;  %998 = vperm.xlu1 %1324, %v920_v18   ;;  %v663_v50 = vadd.f32 %v1970_v59, %v435_v20 }
  0xf5   :  { %2521 = vst [vmem:[#allocation43_spill] sm:$0xff] %v2033_v61  ;;  %2522 = vst [vmem:[#allocation2_spill] sm:$0xff] %v2035_v42  ;;  %v420_v21 = vadd.f32 %v2527_v40, %v192_v57  ;;  %v2052_v42 = vpop.permute.xlu1 %702  ;;  %v2528_v61 = vld [vmem:[#allocation34_spill] sm:$0xff]  ;;  %v434_v35 = vadd.f32 %v2529_v17, %v206_v28  ;;  %v800_v57 = vmul.f32 %v1595_v56, %v1890_v39  ;;  %v2532_v49 = vld [vmem:[#allocation21_spill] sm:$0xff] }
  0xf6   :  { %v433_v37 = vadd.f32 %v2528_v61, %v205_v26  ;;  %v799_v61 = vmul.f32 %v1593_v55, %v1890_v39  ;;  %v645_v58 = vadd.f32 %v1924_v30, %v417_v31  ;;  %v646_v0 = vadd.f32 %v1928_v11, %v418_v12  ;;  %v2533_v39 = vld [vmem:[#allocation22_spill] sm:$0xff]  ;;  %v2534_v30 = vld [vmem:[#allocation23_spill] sm:$0xff]  ;;  %v2535_v11 = vld [vmem:[#allocation24_spill] sm:$0xff] }
  0xf7   :  { %v647_v4 = vadd.f32 %v1932_v63, %v419_v44  ;;  %v648_v6 = vadd.f32 %v1938_v2, %v420_v21  ;;  %v662_v33 = vadd.f32 %v1966_v8, %v434_v35  ;;  %v664_v22 = vadd.f32 %v1974_v29, %v436_v47 }
  0xf8   :  { %v661_v23 = vadd.f32 %v1953_v10, %v433_v37  ;;  %v2079_v63 = vadd.f32 %v1983_v15, %v645_v58  ;;  %v2082_v2 = vadd.f32 %v1987_v41, %v646_v0  ;;  %v861_v47 = vadd.f32 %v797_v14, %v633_v3 }
  0xf9   :  { %v944_v13 = vpop.permute.xlu1 %943  ;;  %v2085_v35 = vadd.f32 %v1991_v54, %v647_v4  ;;  %v2088_v10 = vadd.f32 %v1995_v25, %v648_v6  ;;  %v862_v8 = vadd.f32 %v798_v16, %v634_v43  ;;  %v863_v59 = vadd.f32 %v799_v61, %v635_v62 }
  0xfa   :  { %v1017_v26 = vadd.f32 %v944_v13, %v2532_v49  ;;  %v1018_v28 = vadd.f32 %v944_v13, %v2533_v39  ;;  %v1019_v48 = vadd.f32 %v944_v13, %v2534_v30  ;;  %v1020_v45 = vadd.f32 %v944_v13, %v2535_v11 }
  0xfb   :  { %v864_v29 = vadd.f32 %v800_v57, %v636_v24  ;;  %v2090_v37 = vadd.f32 %v825_v5, %v661_v23  ;;  %v2092_v18 = vadd.f32 %v826_v34, %v662_v33  ;;  %v2094_v15 = vadd.f32 %v827_v9, %v663_v50  ;;  %v2541_v57 = vld [vmem:[#allocation41_spill] sm:$0xff]  ;;  %v2542_v23 = vld [vmem:[#allocation46_spill] sm:$0xff] }
  0xfc   :  { %v2096_v19 = vadd.f32 %v828_v7, %v664_v22  ;;  %v1082_v12 = vmax.f32 %v1018_v28, 0.0  ;;  %v1084_v25 = vmax.f32 %v1020_v45, 0.0  ;;  %v1081_v60 = vmax.f32 %v1017_v26, 0.0  ;;  %v2540_v7 = vld [vmem:[#allocation19_spill] sm:$0xff]  ;;  %v2543_v22 = vld [vmem:[#allocation9_spill] sm:$0xff]  ;;  %v2545_v28 = vld [vmem:[#allocation48_spill] sm:$0xff] }
  0xfd   :  { %v949_v17 = vpop.permute.xlu1 %948  ;;  %2536 = vst [vmem:[#allocation3_spill] sm:$0xff] %v2090_v37  ;;  %2537 = vst [vmem:[#allocation5_spill] sm:$0xff] %v2092_v18  ;;  %v1083_v3 = vmax.f32 %v1019_v48, 0.0  ;;  %v805_v24 = vmul.f32 %v1589_v53, %v2540_v7  ;;  %v806_v14 = vmul.f32 %v1591_v52, %v2540_v7  ;;  %v807_v16 = vmul.f32 %v1593_v55, %v2540_v7  ;;  %v2544_v26 = vld [vmem:[#allocation11_spill] sm:$0xff] }
  0xfe   :  { %2538 = vst [vmem:[#allocation20_spill] sm:$0xff] %v2094_v15  ;;  %2539 = vst [vmem:[#allocation6_spill] sm:$0xff] %v2096_v19  ;;  %v1021_v41 = vadd.f32 %v949_v17, %v861_v47  ;;  %v1022_v31 = vadd.f32 %v949_v17, %v862_v8  ;;  %v1023_v54 = vadd.f32 %v949_v17, %v863_v59  ;;  %v2546_v47 = vld [vmem:[#allocation47_spill] sm:$0xff] }
  0xff   :  { %v1024_v46 = vadd.f32 %v949_v17, %v864_v29  ;;  %v808_v61 = vmul.f32 %v1595_v56, %v2540_v7  ;;  %v181_v58 = vmul.f32 %v1570_v27, %v2541_v57  ;;  %v182_v0 = vmul.f32 %v2514_v32, %v2541_v57 }
 0x100   :  { %v1086_v43 = vmax.f32 %v1022_v31, 0.0  ;;  %v1085_v44 = vmax.f32 %v1021_v41, 0.0  ;;  %v1087_v40 = vmax.f32 %v1023_v54, 0.0  ;;  %v183_v4 = vmul.f32 %v1574_v38, %v2541_v57  ;;  %v2547_v41 = vld [vmem:[#allocation39_spill] sm:$0xff]  ;;  %v2548_v31 = vld [vmem:[#allocation10_spill] sm:$0xff] }
 0x101   :  { %v1088_v62 = vmax.f32 %v1024_v46, 0.0  ;;  %v184_v6 = vmul.f32 %v2515_v1, %v2541_v57  ;;  %v345_v33 = vmul.f32 %v2507_v36, %v2542_v23  ;;  %v346_v50 = vmul.f32 %v2508_v51, %v2542_v23  ;;  %v2549_v46 = vld [vmem:[#allocation13_spill] sm:$0xff] }
 0x102   :  { %v2098_v5 = vpop.permute.xlu1 %486  ;;  %v1140_v34 = vpack.c.bf16 %v1086_v43, %v1082_v12  ;;  %v1139_v9 = vpack.c.bf16 %v1085_v44, %v1081_v60  ;;  %v1141_v20 = vpack.c.bf16 %v1087_v40, %v1083_v3  ;;  %v347_v49 = vmul.f32 %v2543_v22, %v2542_v23  ;;  %v2551_v3 = vld [vmem:[#allocation14_spill] sm:$0xff] }
 0x103   :  { %v1142_v21 = vpack.c.bf16 %v1088_v62, %v1084_v25  ;;  %v348_v39 = vmul.f32 %v2544_v26, %v2542_v23  ;;  %v185_v30 = vmul.f32 %v1570_v27, %v2545_v28  ;;  %v186_v48 = vmul.f32 %v2514_v32, %v2545_v28  ;;  %v2550_v25 = vld [vmem:[#allocation12_spill] sm:$0xff] }
 0x104   :  { %1173 = vmatprep.subr.bf16.mxu0 %v1140_v34  ;;  %v187_v11 = vmul.f32 %v1574_v38, %v2545_v28  ;;  %v188_v45 = vmul.f32 %v2515_v1, %v2545_v28  ;;  %v349_v8 = vmul.f32 %v2507_v36, %v2546_v47  ;;  %v350_v59 = vmul.f32 %v2508_v51, %v2546_v47 }
 0x105   :  { %1214 = vmatprep.subr.bf16.mxu1 %v1142_v21  ;;  %1174 = vmatpush1.bf16.msra.mxu0 %v1139_v9  ;;  %v351_v29 = vmul.f32 %v2543_v22, %v2546_v47  ;;  %v352_v17 = vmul.f32 %v2544_v26, %v2546_v47  ;;  %v577_v54 = vmul.f32 %v2548_v31, %v2547_v41 }
 0x106   :  { %1215 = vmatpush1.bf16.msra.mxu1 %v1141_v20  ;;  %v578_v12 = vmul.f32 %v2549_v46, %v2547_v41  ;;  %v579_v60 = vmul.f32 %v2550_v25, %v2547_v41  ;;  %v580_v43 = vmul.f32 %v2551_v3, %v2547_v41  ;;  %v413_v23 = vadd.f32 %v349_v8, %v185_v30 }
 0x107   :  { %v92_v13 = vpop.permute.xlu1 %91  ;;  %v414_v28 = vadd.f32 %v350_v59, %v186_v48  ;;  %v415_v47 = vadd.f32 %v351_v29, %v187_v11  ;;  %v416_v41 = vadd.f32 %v352_v17, %v188_v45  ;;  %v411_v30 = vadd.f32 %v347_v49, %v183_v4  ;;  %v2552_v11 = vld [vmem:[#allocation35_spill] sm:$0xff] }
 0x108   :  { %v197_v62 = vmul.f32 %v1570_v27, %v92_v13  ;;  %v198_v44 = vmul.f32 %v2514_v32, %v92_v13  ;;  %v199_v40 = vmul.f32 %v1574_v38, %v92_v13  ;;  %v200_v34 = vmul.f32 %v2515_v1, %v92_v13 }
 0x109   :  { %v641_v37 = vadd.f32 %v577_v54, %v413_v23  ;;  %v643_v1 = vadd.f32 %v579_v60, %v415_v47  ;;  %v409_v27 = vadd.f32 %v345_v33, %v181_v58  ;;  %v412_v48 = vadd.f32 %v348_v39, %v184_v6 }
 0x10a   :  { %v573_v45 = vmul.f32 %v2548_v31, %v2552_v11  ;;  %v574_v8 = vmul.f32 %v2549_v46, %v2552_v11  ;;  %v575_v59 = vmul.f32 %v2550_v25, %v2552_v11  ;;  %v576_v29 = vmul.f32 %v2551_v3, %v2552_v11 }
 0x10b   :  { %v869_v17 = vadd.f32 %v805_v24, %v641_v37  ;;  %v801_v58 = vmul.f32 %v1589_v53, %v2052_v42  ;;  %v803_v4 = vmul.f32 %v1593_v55, %v2052_v42  ;;  %v804_v6 = vmul.f32 %v1595_v56, %v2052_v42 }
 0x10c   :  { %v263_v21 = vpop.permute.xlu1 %262  ;;  %v639_v39 = vadd.f32 %v575_v59, %v411_v30  ;;  %v640_v37 = vadd.f32 %v576_v29, %v412_v48 }
 0x10d   :  { %v361_v9 = vmul.f32 %v2507_v36, %v263_v21  ;;  %v362_v20 = vmul.f32 %v2508_v51, %v263_v21  ;;  %v363_v7 = vmul.f32 %v2543_v22, %v263_v21  ;;  %v364_v57 = vmul.f32 %v2544_v26, %v263_v21 }
 0x10e   :  { %v642_v36 = vadd.f32 %v578_v12, %v414_v28  ;;  %v644_v51 = vadd.f32 %v580_v43, %v416_v41  ;;  %v410_v21 = vadd.f32 %v346_v50, %v182_v0  ;;  %v871_v12 = vadd.f32 %v807_v16, %v643_v1 }
 0x10f   :  { %v2156_v19 = vadd.f32 %v361_v9, %v197_v62  ;;  %v2158_v15 = vadd.f32 %v362_v20, %v198_v44  ;;  %v2160_v18 = vadd.f32 %v363_v7, %v199_v40  ;;  %v2162_v13 = vadd.f32 %v364_v57, %v200_v34 }
 0x110   :  { %v2164_v32 = vpop.permute.xlu1 %266  ;;  %v870_v54 = vadd.f32 %v806_v14, %v642_v36  ;;  %v872_v60 = vadd.f32 %v808_v61, %v644_v51  ;;  %v802_v0 = vmul.f32 %v1591_v52, %v2052_v42  ;;  %v637_v50 = vadd.f32 %v573_v45, %v409_v27  ;;  %v2553_v36 = vld [vmem:[#allocation45_spill] sm:$0xff] }
 0x111   :  { %v638_v49 = vadd.f32 %v574_v8, %v410_v21  ;;  %v1029_v1 = vadd.f32 %v2553_v36, %v869_v17  ;;  %v1031_v24 = vadd.f32 %v2553_v36, %v871_v12  ;;  %v867_v43 = vadd.f32 %v803_v4, %v639_v39  ;;  %v2554_v8 = vld [vmem:[#allocation44_spill] sm:$0xff] }
 0x112   :  { %v1030_v51 = vadd.f32 %v2553_v36, %v870_v54  ;;  %v1032_v14 = vadd.f32 %v2553_v36, %v872_v60  ;;  %v865_v16 = vadd.f32 %v801_v58, %v637_v50  ;;  %v868_v62 = vadd.f32 %v804_v6, %v640_v37  ;;  %v2555_v60 = vld [vmem:[#allocation26_spill] sm:$0xff] }
 0x113   :  { %v866_v61 = vadd.f32 %v802_v0, %v638_v49  ;;  %v1093_v7 = vmax.f32 %v1029_v1, 0.0  ;;  %v1095_v57 = vmax.f32 %v1031_v24, 0.0  ;;  %v203_v59 = vmul.f32 %v1574_v38, %v2554_v8 }
 0x114   :  { %v1094_v9 = vmax.f32 %v1030_v51, 0.0  ;;  %v1096_v20 = vmax.f32 %v1032_v14, 0.0  ;;  %v367_v29 = vmul.f32 %v2543_v22, %v2164_v32  ;;  %v823_v58 = vmul.f32 %v1593_v55, %v2555_v60 }
 0x115   :  { %v715_v33 = vpop.permute.xlu1 %714  ;;  %v585_v39 = vmul.f32 %v2548_v31, %v2098_v5  ;;  %v586_v37 = vmul.f32 %v2549_v46, %v2098_v5  ;;  %v587_v36 = vmul.f32 %v2550_v25, %v2098_v5  ;;  %v588_v1 = vmul.f32 %v2551_v3, %v2098_v5 }
 0x116   :  { %v431_v54 = vadd.f32 %v367_v29, %v203_v59  ;;  %v813_v51 = vmul.f32 %v1589_v53, %v715_v33  ;;  %v814_v24 = vmul.f32 %v1591_v52, %v715_v33  ;;  %v815_v14 = vmul.f32 %v1593_v55, %v715_v33 }
 0x11a   :  { %v954_v44 = vpop.permute.xlu1 %953 }
 0x11b   :  { %v1025_v40 = vadd.f32 %v954_v44, %v865_v16  ;;  %v1026_v42 = vadd.f32 %v954_v44, %v866_v61  ;;  %v1027_v34 = vadd.f32 %v954_v44, %v867_v43  ;;  %v1028_v27 = vadd.f32 %v954_v44, %v868_v62  ;;  %v2556_v43 = vld [vmem:[#allocation28_spill] sm:$0xff]  ;;  %v2557_v44 = vld [vmem:[#allocation42_spill] sm:$0xff] }
 0x11c   :  { %v816_v16 = vmul.f32 %v1595_v56, %v715_v33  ;;  %v649_v62 = vadd.f32 %v585_v39, %v2556_v43 }
 0x11d   :  { %v1090_v23 = vmax.f32 %v1026_v42, 0.0  ;;  %v1092_v28 = vmax.f32 %v1028_v27, 0.0  ;;  %v1089_v47 = vmax.f32 %v1025_v40, 0.0  ;;  %v1091_v41 = vmax.f32 %v1027_v34, 0.0  ;;  %v2558_v42 = vld [vmem:[#allocation43_spill] sm:$0xff]  ;;  %v2559_v27 = vld [vmem:[#allocation2_spill] sm:$0xff] }
 0x11e   :  { %v650_v40 = vadd.f32 %v586_v37, %v2557_v44  ;;  %v651_v34 = vadd.f32 %v587_v36, %v2558_v42 }
 0x11f   :  { %v2186_v21 = vpop.permute.xlu1 %490  ;;  %v1144_v30 = vpack.c.bf16 %v1094_v9, %v1090_v23  ;;  %v1146_v48 = vpack.c.bf16 %v1096_v20, %v1092_v28  ;;  %v1143_v11 = vpack.c.bf16 %v1093_v7, %v1089_v47  ;;  %v1145_v45 = vpack.c.bf16 %v1095_v57, %v1091_v41 }
 0x120   :  { %v652_v9 = vadd.f32 %v588_v1, %v2559_v27  ;;  %v877_v23 = vadd.f32 %v813_v51, %v649_v62  ;;  %v878_v28 = vadd.f32 %v814_v24, %v650_v40  ;;  %v879_v33 = vadd.f32 %v815_v14, %v651_v34  ;;  %v2560_v1 = vld [vmem:[#allocation15_spill] sm:$0xff]  ;;  %v2561_v24 = vld [vmem:[#allocation16_spill] sm:$0xff] }
 0x121   :  { %1175 = vmatprep.subr.bf16.mxu0 %v1144_v30  ;;  %1216 = vmatprep.subr.bf16.mxu1 %v1146_v48  ;;  %v201_v51 = vmul.f32 %v2560_v1, %v2554_v8  ;;  %v202_v14 = vmul.f32 %v2561_v24, %v2554_v8  ;;  %v2563_v62 = vld [vmem:[#allocation7_spill] sm:$0xff]  ;;  %v2564_v40 = vld [vmem:[#allocation8_spill] sm:$0xff]  ;;  %v368_v34 = vmul.f32 %v2544_v26, %v2164_v32 }
 0x122   :  { %1176 = vmatpush1.bf16.msra.mxu0 %v1143_v11  ;;  %1217 = vmatpush1.bf16.msra.mxu1 %v1145_v45  ;;  %v880_v47 = vadd.f32 %v816_v16, %v652_v9  ;;  %v365_v44 = vmul.f32 %v2563_v62, %v2164_v32  ;;  %v366_v42 = vmul.f32 %v2564_v40, %v2164_v32 }
 0x123   :  { %v495_v17 = vpop.permute.xlu1 %494  ;;  %v822_v32 = vmul.f32 %v1591_v52, %v2555_v60 }
 0x124   :  { %v595_v12 = vmul.f32 %v2550_v25, %v495_v17  ;;  %v593_v27 = vmul.f32 %v2548_v31, %v495_v17  ;;  %v594_v9 = vmul.f32 %v2549_v46, %v495_v17 }
 0x126   :  { %v659_v0 = vadd.f32 %v595_v12, %v431_v54 }
 0x128   :  { %v2195_v4 = vpop.permute.xlu1 %106  ;;  %v2197_v6 = vadd.f32 %v823_v58, %v659_v0 }
 0x12d   :  { %v2199_v50 = vpop.permute.xlu1 %274 }
 0x132   :  { %v2201_v49 = vpop.permute.xlu1 %718 }
 0x137   :  { %v964_v61 = vpop.permute.xlu1 %963 }
 0x138   :  { %v1033_v20 = vadd.f32 %v964_v61, %v2079_v63  ;;  %v1034_v5 = vadd.f32 %v964_v61, %v2082_v2  ;;  %v1035_v7 = vadd.f32 %v964_v61, %v2085_v35  ;;  %v1036_v57 = vadd.f32 %v964_v61, %v2088_v10  ;;  %v2562_v61 = vld [vmem:[#allocation17_spill] sm:$0xff] }
 0x139   :  { %v204_v43 = vmul.f32 %v2562_v61, %v2554_v8  ;;  %v117_v8 = vpop.permute.xlu0 %116 }
 0x13a   :  { %v1098_v59 = vmax.f32 %v1034_v5, 0.0  ;;  %v1100_v29 = vmax.f32 %v1036_v57, 0.0  ;;  %v1097_v54 = vmax.f32 %v1033_v20, 0.0  ;;  %v1099_v12 = vmax.f32 %v1035_v7, 0.0 }
 0x13b   :  { %v969_v41 = vpop.permute.xlu1 %968  ;;  %v596_v20 = vmul.f32 %v2551_v3, %v495_v17  ;;  %v429_v5 = vadd.f32 %v365_v44, %v201_v51  ;;  %v430_v7 = vadd.f32 %v366_v42, %v202_v14  ;;  %v432_v57 = vadd.f32 %v368_v34, %v204_v43 }
 0x13c   :  { %v1037_v30 = vadd.f32 %v969_v41, %v877_v23  ;;  %v1038_v48 = vadd.f32 %v969_v41, %v878_v28  ;;  %v1039_v11 = vadd.f32 %v969_v41, %v879_v33  ;;  %v1040_v45 = vadd.f32 %v969_v41, %v880_v47 }
 0x13d   :  { %v657_v28 = vadd.f32 %v593_v27, %v429_v5  ;;  %v658_v33 = vadd.f32 %v594_v9, %v430_v7  ;;  %v660_v47 = vadd.f32 %v596_v20, %v432_v57  ;;  %v821_v41 = vmul.f32 %v1589_v53, %v2555_v60 }
 0x13e   :  { %v1102_v63 = vmax.f32 %v1038_v48, 0.0  ;;  %v1104_v58 = vmax.f32 %v1040_v45, 0.0  ;;  %v1101_v2 = vmax.f32 %v1037_v30, 0.0  ;;  %v1103_v0 = vmax.f32 %v1039_v11, 0.0 }
 0x13f   :  { %v824_v30 = vmul.f32 %v1595_v56, %v2555_v60  ;;  %v589_v17 = vmul.f32 %v2548_v31, %v2186_v21  ;;  %v885_v11 = vadd.f32 %v821_v41, %v657_v28  ;;  %v886_v45 = vadd.f32 %v822_v32, %v658_v33  ;;  %v979_v60 = vpop.permute.xlu0 %978 }
 0x140   :  { %v2223_v35 = vpop.permute.xlu1 %502  ;;  %v1148_v10 = vpack.c.bf16 %v1102_v63, %v1098_v59  ;;  %v1150_v39 = vpack.c.bf16 %v1104_v58, %v1100_v29  ;;  %v1147_v37 = vpack.c.bf16 %v1101_v2, %v1097_v54  ;;  %v1149_v36 = vpack.c.bf16 %v1103_v0, %v1099_v12 }
 0x141   :  { %v888_v59 = vadd.f32 %v824_v30, %v660_v47  ;;  %v590_v29 = vmul.f32 %v2549_v46, %v2186_v21  ;;  %v591_v54 = vmul.f32 %v2550_v25, %v2186_v21  ;;  %v592_v12 = vmul.f32 %v2551_v3, %v2186_v21 }
 0x142   :  { %1177 = vmatprep.subr.bf16.mxu0 %v1148_v10  ;;  %1218 = vmatprep.subr.bf16.mxu1 %v1150_v39  ;;  %v2261_v63 = vmul.f32 %v2560_v1, %v117_v8  ;;  %v653_v58 = vadd.f32 %v589_v17, %v2156_v19  ;;  %v2265_v2 = vmul.f32 %v2561_v24, %v117_v8 }
 0x143   :  { %1178 = vmatpush1.bf16.msra.mxu0 %v1147_v37  ;;  %1219 = vmatpush1.bf16.msra.mxu1 %v1149_v36  ;;  %v2268_v0 = vmul.f32 %v1574_v38, %v117_v8  ;;  %v2271_v10 = vmul.f32 %v2562_v61, %v117_v8  ;;  %v817_v39 = vmul.f32 %v1589_v53, %v2201_v49 }
 0x144   :  { %v818_v21 = vmul.f32 %v1591_v52, %v2201_v49  ;;  %v819_v37 = vmul.f32 %v1593_v55, %v2201_v49  ;;  %v820_v19 = vmul.f32 %v1595_v56, %v2201_v49  ;;  %v1045_v51 = vadd.f32 %v979_v60, %v885_v11 }
 0x145   :  { %v2229_v16 = vpop.permute.xlu1 %111  ;;  %v1046_v14 = vadd.f32 %v979_v60, %v886_v45  ;;  %v1047_v43 = vadd.f32 %v979_v60, %v2197_v6  ;;  %v1048_v44 = vadd.f32 %v979_v60, %v888_v59  ;;  %v654_v42 = vadd.f32 %v590_v29, %v2158_v15 }
 0x146   :  { %v655_v34 = vadd.f32 %v591_v54, %v2160_v18  ;;  %v656_v27 = vadd.f32 %v592_v12, %v2162_v13  ;;  %v209_v9 = vmul.f32 %v2560_v1, %v2195_v4  ;;  %v210_v20 = vmul.f32 %v2561_v24, %v2195_v4 }
 0x147   :  { %v211_v49 = vmul.f32 %v1574_v38, %v2195_v4  ;;  %v212_v5 = vmul.f32 %v2562_v61, %v2195_v4  ;;  %v373_v6 = vmul.f32 %v2563_v62, %v2199_v50  ;;  %v881_v15 = vadd.f32 %v817_v39, %v653_v58 }
 0x148   :  { %v882_v7 = vadd.f32 %v818_v21, %v654_v42  ;;  %v883_v18 = vadd.f32 %v819_v37, %v655_v34  ;;  %v884_v57 = vadd.f32 %v820_v19, %v656_v27  ;;  %v1110_v8 = vmax.f32 %v1046_v14, 0.0 }
 0x149   :  { %v1112_v28 = vmax.f32 %v1048_v44, 0.0  ;;  %v1109_v33 = vmax.f32 %v1045_v51, 0.0  ;;  %v1111_v47 = vmax.f32 %v1047_v43, 0.0  ;;  %v374_v11 = vmul.f32 %v2564_v40, %v2199_v50 }
 0x14a   :  { %v2242_v23 = vpop.permute.xlu1 %278  ;;  %v375_v4 = vmul.f32 %v2543_v22, %v2199_v50  ;;  %v376_v45 = vmul.f32 %v2544_v26, %v2199_v50  ;;  %v437_v59 = vadd.f32 %v373_v6, %v209_v9  ;;  %v601_v58 = vmul.f32 %v2548_v31, %v2223_v35 }
 0x14b   :  { %v602_v39 = vmul.f32 %v2549_v46, %v2223_v35  ;;  %v603_v21 = vmul.f32 %v2550_v25, %v2223_v35  ;;  %v604_v37 = vmul.f32 %v2551_v3, %v2223_v35  ;;  %v438_v44 = vadd.f32 %v374_v11, %v210_v20 }
 0x14c   :  { %v439_v42 = vadd.f32 %v375_v4, %v211_v49  ;;  %v440_v34 = vadd.f32 %v376_v45, %v212_v5  ;;  %v377_v20 = vmul.f32 %v2563_v62, %v2242_v23  ;;  %v378_v49 = vmul.f32 %v2564_v40, %v2242_v23 }
 0x14d   :  { %v666_v35 = vadd.f32 %v602_v39, %v438_v44  ;;  %v379_v5 = vmul.f32 %v2543_v22, %v2242_v23 }
 0x14e   :  { %v2252_v48 = vpop.permute.xlu1 %282 }
 0x153   :  { %v731_v36 = vpop.permute.xlu1 %730 }
 0x154   :  { %v829_v27 = vmul.f32 %v1589_v53, %v731_v36  ;;  %v830_v9 = vmul.f32 %v1591_v52, %v731_v36  ;;  %v831_v6 = vmul.f32 %v1593_v55, %v731_v36 }
 0x158   :  { %v974_v13 = vpop.permute.xlu1 %973 }
 0x159   :  { %v1041_v41 = vadd.f32 %v974_v13, %v881_v15  ;;  %v1042_v32 = vadd.f32 %v974_v13, %v882_v7  ;;  %v1043_v30 = vadd.f32 %v974_v13, %v883_v18  ;;  %v1044_v17 = vadd.f32 %v974_v13, %v884_v57 }
 0x15a   :  { %v832_v15 = vmul.f32 %v1595_v56, %v731_v36  ;;  %v665_v7 = vadd.f32 %v601_v58, %v437_v59  ;;  %v667_v18 = vadd.f32 %v603_v21, %v439_v42  ;;  %v668_v57 = vadd.f32 %v604_v37, %v440_v34 }
 0x15b   :  { %v1106_v29 = vmax.f32 %v1042_v32, 0.0  ;;  %v1108_v54 = vmax.f32 %v1044_v17, 0.0  ;;  %v1105_v12 = vmax.f32 %v1041_v41, 0.0  ;;  %v1107_v60 = vmax.f32 %v1043_v30, 0.0 }
 0x15c   :  { %v380_v13 = vmul.f32 %v2544_v26, %v2242_v23  ;;  %v213_v36 = vmul.f32 %v2560_v1, %v2229_v16  ;;  %v893_v41 = vadd.f32 %v829_v27, %v665_v7  ;;  %v894_v32 = vadd.f32 %v830_v9, %v666_v35 }
 0x15d   :  { %v507_v19 = vpop.permute.xlu1 %506  ;;  %v1152_v51 = vpack.c.bf16 %v1110_v8, %v1106_v29  ;;  %v1154_v50 = vpack.c.bf16 %v1112_v28, %v1108_v54  ;;  %v1151_v14 = vpack.c.bf16 %v1109_v33, %v1105_v12  ;;  %v1153_v43 = vpack.c.bf16 %v1111_v47, %v1107_v60  ;;  %v989_v29 = vpop.permute.xlu0 %988 }
 0x15e   :  { %v214_v8 = vmul.f32 %v2561_v24, %v2229_v16  ;;  %v215_v28 = vmul.f32 %v1574_v38, %v2229_v16  ;;  %v216_v33 = vmul.f32 %v2562_v61, %v2229_v16  ;;  %v895_v30 = vadd.f32 %v831_v6, %v667_v18 }
 0x15f   :  { %1179 = vmatprep.subr.bf16.mxu0 %v1152_v51  ;;  %1220 = vmatprep.subr.bf16.mxu1 %v1154_v50  ;;  %v896_v17 = vadd.f32 %v832_v15, %v668_v57  ;;  %v605_v23 = vmul.f32 %v2548_v31, %v507_v19  ;;  %v606_v11 = vmul.f32 %v2549_v46, %v507_v19 }
 0x160   :  { %1180 = vmatpush1.bf16.msra.mxu0 %v1151_v14  ;;  %1221 = vmatpush1.bf16.msra.mxu1 %v1153_v43  ;;  %v607_v1 = vmul.f32 %v2550_v25, %v507_v19  ;;  %v608_v4 = vmul.f32 %v2551_v3, %v507_v19  ;;  %v441_v24 = vadd.f32 %v377_v20, %v213_v36  ;;  %v2565_v43 = vld [vmem:[#allocation30_spill] sm:$0xff] }
 0x161   :  { %v511_v47 = vpop.permute.xlu1 %510  ;;  %v442_v45 = vadd.f32 %v378_v49, %v214_v8  ;;  %v443_v59 = vadd.f32 %v379_v5, %v215_v28  ;;  %v444_v38 = vadd.f32 %v380_v13, %v216_v33  ;;  %v381_v16 = vmul.f32 %v2563_v62, %v2252_v48  ;;  %v2568_v8 = vld [vmem:[#allocation20_spill] sm:$0xff]  ;;  %v2569_v33 = vld [vmem:[#allocation6_spill] sm:$0xff] }
 0x162   :  { %v382_v61 = vmul.f32 %v2564_v40, %v2252_v48  ;;  %v383_v54 = vmul.f32 %v2543_v22, %v2252_v48  ;;  %v384_v12 = vmul.f32 %v2544_v26, %v2252_v48  ;;  %v1054_v58 = vadd.f32 %v989_v29, %v894_v32 }
 0x163   :  { %v1056_v39 = vadd.f32 %v989_v29, %v896_v17  ;;  %v1053_v21 = vadd.f32 %v989_v29, %v893_v41  ;;  %v1055_v37 = vadd.f32 %v989_v29, %v895_v30  ;;  %v669_v19 = vadd.f32 %v605_v23, %v441_v24 }
 0x164   :  { %v670_v51 = vadd.f32 %v606_v11, %v442_v45  ;;  %v671_v50 = vadd.f32 %v607_v1, %v443_v59  ;;  %v672_v14 = vadd.f32 %v608_v4, %v444_v38  ;;  %v833_v62 = vmul.f32 %v1589_v53, %v2565_v43 }
 0x165   :  { %v834_v40 = vmul.f32 %v1591_v52, %v2565_v43  ;;  %v835_v22 = vmul.f32 %v1593_v55, %v2565_v43  ;;  %v836_v26 = vmul.f32 %v1595_v56, %v2565_v43  ;;  %v445_v48 = vadd.f32 %v381_v16, %v2261_v63 }
 0x166   :  { %v739_v60 = vpop.permute.xlu1 %738  ;;  %v446_v44 = vadd.f32 %v382_v61, %v2265_v2  ;;  %v447_v42 = vadd.f32 %v383_v54, %v2268_v0  ;;  %v448_v34 = vadd.f32 %v384_v12, %v2271_v10  ;;  %v1118_v27 = vmax.f32 %v1054_v58, 0.0  ;;  %v2566_v0 = vld [vmem:[#allocation3_spill] sm:$0xff]  ;;  %v2567_v10 = vld [vmem:[#allocation5_spill] sm:$0xff] }
 0x167   :  { %v1120_v9 = vmax.f32 %v1056_v39, 0.0  ;;  %v1117_v6 = vmax.f32 %v1053_v21, 0.0  ;;  %v1119_v15 = vmax.f32 %v1055_v37, 0.0  ;;  %v897_v7 = vadd.f32 %v833_v62, %v669_v19 }
 0x168   :  { %v898_v35 = vadd.f32 %v834_v40, %v670_v51  ;;  %v899_v18 = vadd.f32 %v835_v22, %v671_v50  ;;  %v900_v57 = vadd.f32 %v836_v26, %v672_v14  ;;  %v609_v20 = vmul.f32 %v2548_v31, %v511_v47  ;;  %v1129_v26 = vld [vmem:[%s2376_s3] sm:$0x3] }
 0x169   :  { %v610_v49 = vmul.f32 %v2549_v46, %v511_v47  ;;  %v611_v63 = vmul.f32 %v2550_v25, %v511_v47  ;;  %v612_v2 = vmul.f32 %v2551_v3, %v511_v47  ;;  %v837_v32 = vmul.f32 %v1589_v53, %v739_v60 }
 0x16a   :  { %v838_v30 = vmul.f32 %v1591_v52, %v739_v60  ;;  %v839_v31 = vmul.f32 %v1593_v55, %v739_v60  ;;  %v840_v46 = vmul.f32 %v1595_v56, %v739_v60  ;;  %v673_v11 = vadd.f32 %v609_v20, %v445_v48 }
 0x16b   :  { %v984_v5 = vpop.permute.xlu1 %983  ;;  %v674_v1 = vadd.f32 %v610_v49, %v446_v44  ;;  %v675_v4 = vadd.f32 %v611_v63, %v447_v42  ;;  %v676_v24 = vadd.f32 %v612_v2, %v448_v34 }
 0x16c   :  { %v1049_v13 = vadd.f32 %v984_v5, %v2566_v0  ;;  %v1050_v36 = vadd.f32 %v984_v5, %v2567_v10  ;;  %v1051_v28 = vadd.f32 %v984_v5, %v2568_v8  ;;  %v1052_v41 = vadd.f32 %v984_v5, %v2569_v33  ;;  %v2570_v5 = vld [vmem:[#allocation4_spill] sm:$0xff] }
 0x16d   :  { %v901_v55 = vadd.f32 %v837_v32, %v673_v11  ;;  %v902_v54 = vadd.f32 %v838_v30, %v674_v1  ;;  %v903_v56 = vadd.f32 %v839_v31, %v675_v4  ;;  %v904_v12 = vadd.f32 %v840_v46, %v676_v24 }
 0x16e   :  { %v1114_v25 = vmax.f32 %v1050_v36, 0.0  ;;  %v1116_v17 = vmax.f32 %v1052_v41, 0.0  ;;  %v1113_v3 = vmax.f32 %v1049_v13, 0.0  ;;  %v1115_v47 = vmax.f32 %v1051_v28, 0.0 }
 0x16f   :  { %v994_v23 = vpop.permute.xlu1 %993 }
 0x170   :  { %v1057_v45 = vadd.f32 %v994_v23, %v897_v7  ;;  %v1058_v59 = vadd.f32 %v994_v23, %v898_v35  ;;  %v1059_v38 = vadd.f32 %v994_v23, %v899_v18  ;;  %v1060_v29 = vadd.f32 %v994_v23, %v900_v57  ;;  %v1167_v7 = vpop.permute.xlu0 %1166 }
 0x171   :  { %v1156_v53 = vpack.c.bf16 %v1118_v27, %v1114_v25  ;;  %v1158_v16 = vpack.c.bf16 %v1120_v9, %v1116_v17  ;;  %v1155_v52 = vpack.c.bf16 %v1117_v6, %v1113_v3  ;;  %v1157_v61 = vpack.c.bf16 %v1119_v15, %v1115_v47 }
 0x172   :  { %v1122_v19 = vmax.f32 %v1058_v59, 0.0  ;;  %v1124_v51 = vmax.f32 %v1060_v29, 0.0  ;;  %v1121_v50 = vmax.f32 %v1057_v45, 0.0  ;;  %v1123_v14 = vmax.f32 %v1059_v38, 0.0 }
 0x173   :  { %1181 = vmatprep.subr.bf16.mxu0 %v1156_v53  ;;  %1222 = vmatprep.subr.bf16.mxu1 %v1158_v16  ;;  %v999_v60 = vpop.permute.xlu1 %998  ;;  %v1130_v27 = vpack.c.bf16 %v1129_v26, %v1129_v26  ;;  %v1329_v9 = vmov 1983009808  }
 0x174   :  { %v1061_v58 = vadd.f32 %v999_v60, %v901_v55  ;;  %v1062_v39 = vadd.f32 %v999_v60, %v902_v54  ;;  %v1063_v21 = vadd.f32 %v999_v60, %v903_v56  ;;  %v1064_v37 = vadd.f32 %v999_v60, %v904_v12  ;;  %1182 = vmatpush1.bf16.msra.mxu0 %v1155_v52 }
 0x175   :  { %1223 = vmatpush1.bf16.msra.mxu1 %v1157_v61  ;;  %v1258_v6 = vunpack.c.l.s4 %v1329_v9 }
 0x176   :  { %v1125_v43 = vmax.f32 %v1061_v58, 0.0  ;;  %v1126_v62 = vmax.f32 %v1062_v39, 0.0  ;;  %v1127_v40 = vmax.f32 %v1063_v21, 0.0  ;;  %v1128_v22 = vmax.f32 %v1064_v37, 0.0 }
 0x177   :  { %v1259_v15 = vunpack.c.0.s8 %v1258_v6 }
 0x178   :  { %v1160_v48 = vpack.c.bf16 %v1126_v62, %v1122_v19  ;;  %v1162_v44 = vpack.c.bf16 %v1128_v22, %v1124_v51  ;;  %v1159_v42 = vpack.c.bf16 %v1125_v43, %v1121_v50  ;;  %v1161_v34 = vpack.c.bf16 %v1127_v40, %v1123_v14 }
 0x179   :  { %v1262_v0 = vsub.s32 %v1259_v15, %v2570_v5 }
 0x17a   :  { %1183 = vmatprep.subr.bf16.mxu0 %v1160_v48  ;;  %1224 = vmatprep.subr.bf16.mxu1 %v1162_v44 }
 0x17b   :  { %1184 = vmatpush1.bf16.msra.mxu0 %v1159_v42  ;;  %1225 = vmatpush1.bf16.msra.mxu1 %v1161_v34 }
 0x17e   :  { %1202 = vmatmul.mubr.bf16.vlgmr.msra.gmra.mrb[0].mxu0 %v1130_v27  ;;  %1243 = vmatmul.mubr.bf16.vlgmr.msra.gmra.mrb[0].mxu1 %v1130_v27 }
 0x251   :  { %v1203_v35 = vpop.f32.mrb[0].mxu0  ;;  %v1244_v18 = vpop.f32.mrb[0].mxu1 }
 0x252   :  { %v1204_v57 = vadd.f32 %v1203_v35, %v1167_v7  ;;  %v1245_v20 = vadd.f32 %v1244_v18, %v1167_v7  ;;  %v1205_v49 = vpop.f32.mrb[1].mxu0  ;;  %v1246_v63 = vpop.f32.mrb[1].mxu1 }
 0x253   :  { %v1206_v2 = vadd.f32 %v1205_v49, %v1167_v7  ;;  %v1247_v13 = vadd.f32 %v1246_v63, %v1167_v7  ;;  %v1207_v10 = vpop.f32.mrb[2].mxu0  ;;  %v1248_v36 = vpop.f32.mrb[2].mxu1 }
 0x254   :  { %v1208_v8 = vpop.f32.mrb[3].mxu0  ;;  %v1249_v28 = vpop.f32.mrb[3].mxu1 }
 0x255   :  { %v1255_v33 = vcombine.low %v1204_v57, %v1206_v2  ;;  %v1256_v41 = vcombine.low %v1245_v20, %v1247_v13 }
 0x257   :  { %v1263_v32 = vrot.slane %v1255_v33, %v1262_v0  ;;  %v1270_v30 = vrot.slane %v1256_v41, %v1262_v0 }
 0x259   :  { %v1271_v31 = vcombine.low %v1263_v32, %v1270_v30 }
 0x25b   :  { %1273 = vst [vmem:[%s2377_s5] sm:$0xff] %v1271_v31 }

</bundles_post_ra>
